<compile_context>
chip_gen: v7x
topology: tpu7x:2x2x1
jax: 0.10.0
libtpu: 0.0.40
codegen_flags: <defaults>
</compile_context>

<pallas_src>
import numpy as np
import jax
import jax.numpy as jnp
from jax.experimental import pallas as pl
from jax.experimental.pallas import tpu as pltpu

NEG_SLOPE = 0.01   # nn.LeakyReLU default
BN_EPS = 1e-5      # nn.BatchNorm2d default
PAD_ROWS = 8       # aligned zero sublane-block at the top of each stage scratch


# ----------------------------- fused kernel --------------------------------

def make_fused_kernel(stage_meta, head_meta, batch):
    N = batch
    Hf = head_meta["Hf"]
    n_stage = len(stage_meta)

    def kernel(*refs):
        # refs = [x] + [Bstack, mask0, Rsum, Rt, gb]*n_stage + [Wey, by] + [y] + scratches
        x_ref = refs[0]
        head = 1 + 5 * n_stage
        Wey_ref, by_ref, y_ref = refs[head], refs[head + 1], refs[head + 2]
        scr = refs[head + 3:]                    # s1..s5 (stage inputs), s6 (head input)

        x = x_ref[...]                           # (N*H1, W1*C1) f32, rows=(n,h), cols=(w,c)
        for si, meta in enumerate(stage_meta):
            B_ref, m_ref, Rs_ref, Rt_ref, gb_ref = refs[1 + 5 * si: 1 + 5 * si + 5]
            s_ref = scr[si]
            rows_in, wc_in, noh = meta["rows_in"], meta["wc_in"], meta["rows_out"]

            # Stage input into scratch behind an aligned zero block so the three vertical
            # conv taps become stride-2 sublane loads (no selection matmuls).
            s_ref[pl.ds(0, PAD_ROWS), :] = jnp.zeros((PAD_ROWS, wc_in), jnp.float32)
            s_ref[pl.ds(PAD_ROWS, rows_in), :] = x

            # conv 3x3 / stride 2 / pad 1 as ONE GEMM: tap ki needs input row 2*oh+ki-1,
            # i.e. scratch row (PAD_ROWS-1+ki) + 2*r with r = n*OH+oh.  Tap 0 masks the
            # top-pad / cross-sample rows (oh == 0).
            x0 = s_ref[pl.ds(PAD_ROWS - 1, noh, stride=2), :] * m_ref[...]
            x1 = s_ref[pl.ds(PAD_ROWS, noh, stride=2), :]
            x2 = s_ref[pl.ds(PAD_ROWS + 1, noh, stride=2), :]
            xcat = jnp.concatenate([x0, x1, x2], axis=1).astype(jnp.bfloat16)
            acc = jnp.dot(xcat, B_ref[...],                      # (N*OH, OW*Co), f32 acc
                          preferred_element_type=jnp.float32)

            # BatchNorm (training-mode batch stats) + LeakyReLU.  Conv bias omitted: it is
            # exactly cancelled by the mean subtraction below.
            stats = jnp.concatenate([jnp.sum(acc, axis=0, keepdims=True),
                                     jnp.sum(acc * acc, axis=0, keepdims=True)], axis=0)
            ch = jnp.dot(stats, Rs_ref[...],                     # (2, Co) = [mean, E[x^2]]
                         preferred_element_type=jnp.float32)
            mean = ch[0:1, :]
            var = ch[1:2, :] - mean * mean
            gb = gb_ref[...]                                     # (2, Co) = [gamma, beta]
            scale = gb[0:1, :] * jax.lax.rsqrt(var + BN_EPS)
            shift = gb[1:2, :] - mean * scale
            ssb = jnp.dot(jnp.concatenate([scale, shift], axis=0), Rt_ref[...],
                          preferred_element_type=jnp.float32)    # (2, OW*Co) broadcast
            xn = acc * ssb[0:1, :] + ssb[1:2, :]
            x = jnp.maximum(xn, NEG_SLOPE * xn)                  # LeakyReLU(0.01)

        # Head: flatten + liner_ez + liner_cy precomposed into one GEMM.
        s6 = scr[n_stage]
        s6[...] = x                                              # (N*Hf, Wf*Cf)
        parts = [s6[pl.ds(h, N, stride=Hf), :] for h in range(Hf)]
        ecat = jnp.concatenate(parts, axis=1)                    # (N, Hf*Wf*Cf), cols (h,w,c)
        y_ref[...] = (jnp.dot(ecat, Wey_ref[...], preferred_element_type=jnp.float32)
                      + by_ref[...])

    return kernel


# ----------------------------- weight prep ---------------------------------

def _row_select(out_len, in_len, k):
    """(out_len, in_len) 0/1 matrix selecting input index 2*o + k - 1 for output o
    (all-zero row when out of range -> zero padding)."""
    S = np.zeros((out_len, in_len), np.float32)
    for o in range(out_len):
        i = 2 * o + k - 1
        if 0 <= i < in_len:
            S[o, i] = 1.0
    return S


def prepare_params(params, batch, channel, img_length, hiddens):
    """Fold conv weights + horizontal stride/pad windows into one stacked GEMM operand per
    stage, fold 1/count into the BN reduce matrix, precompose liner_cy into liner_ez."""
    N = batch
    Hin, Win, Cin = img_length, img_length, channel
    const_inputs, stage_meta = [], []
    for (w_t, _b_unused, gamma, beta), Co in zip(params["conv"], hiddens):
        w = np.asarray(w_t, np.float32).transpose(2, 3, 1, 0)    # (kh, kw, Cin, Co)
        OH, OW = Hin // 2, Win // 2
        Bk = [sum(np.kron(_row_select(OW, Win, kj).T, w[ki, kj]) for kj in range(3))
              for ki in range(3)]
        Bstack = np.concatenate(Bk, axis=0)                      # (3*Win*Cin, OW*Co)
        mask0 = (np.arange(N * OH) % OH != 0).astype(np.float32)[:, None]
        count = float(N * OH * OW)
        eyeC = np.eye(Co, dtype=np.float32)
        Rsum = np.kron(np.ones((OW, 1), np.float32), eyeC) / count   # (OW*Co, Co)
        Rt = np.kron(np.ones((1, OW), np.float32), eyeC)             # (Co, OW*Co)
        gb = np.stack([np.asarray(gamma, np.float32), np.asarray(beta, np.float32)])
        const_inputs += [jnp.asarray(Bstack, jnp.bfloat16),
                         jnp.asarray(mask0, jnp.float32),
                         jnp.asarray(Rsum, jnp.float32),
                         jnp.asarray(Rt, jnp.float32),
                         jnp.asarray(gb, jnp.float32)]
        stage_meta.append(dict(rows_in=N * Hin, wc_in=Win * Cin, rows_out=N * OH))
        Hin, Win, Cin = OH, OW, Co

    Hf, Wf, Cf = Hin, Win, Cin
    w_ez = np.asarray(params["w_ez"], np.float32)                # (c_dim, Cf*Hf*Wf)
    b_ez = np.asarray(params["b_ez"], np.float32)
    w_cy = np.asarray(params["w_cy"], np.float32)                # (y_dim, c_dim)
    b_cy = np.asarray(params["b_cy"], np.float32)
    Wey = w_ez.T @ w_cy.T                                        # (feat, y_dim), feat=(c,h,w)
    Wey = Wey.reshape(Cf, Hf, Wf, -1).transpose(1, 2, 0, 3).reshape(Hf * Wf * Cf, -1)
    by = b_ez @ w_cy.T + b_cy
    const_inputs += [jnp.asarray(Wey, jnp.float32), jnp.asarray(by[None, :], jnp.float32)]
    head_meta = dict(Hf=Hf, Wf=Wf, Cf=Cf)
    return const_inputs, stage_meta, head_meta


# ----------------------------- forward wrapper ------------------------------

def make_forward(stage_meta, head_meta, batch, channel, img_length, y_dim):
    kernel = make_fused_kernel(stage_meta, head_meta, batch)
    n_inputs = 1 + 5 * len(stage_meta) + 2
    N, C, H, W = batch, channel, img_length, img_length
    scratch_shapes = [pltpu.VMEM((m["rows_in"] + PAD_ROWS, m["wc_in"]), jnp.float32)
                      for m in stage_meta]
    scratch_shapes.append(
        pltpu.VMEM((N * head_meta["Hf"], head_meta["Wf"] * head_meta["Cf"]), jnp.float32))

    def forward(const_inputs, x_nchw):
        # NCHW -> rows (n, h), cols (w, c).  Free when C == 1 (size-1 axis transpose).
        # TODO(synk): for C > 1 fold this relayout into the stage-1 Bstack column order.
        x2d = jnp.transpose(x_nchw.astype(jnp.float32), (0, 2, 3, 1)).reshape(N * H, W * C)
        return pl.pallas_call(
            kernel,
            out_shape=jax.ShapeDtypeStruct((N, y_dim), jnp.float32),
            in_specs=[pl.BlockSpec(memory_space=pltpu.MemorySpace.VMEM)] * n_inputs,
            out_specs=pl.BlockSpec(memory_space=pltpu.MemorySpace.VMEM),
            scratch_shapes=scratch_shapes,
        )(x2d, *const_inputs)

    return forward


# ----------------------------- params & reference ---------------------------

def init_params(key, channel, hiddens, img_length, c_dim, y_dim):
    """Parameters in PyTorch layout: conv weight (Co,Cin,3,3), Linear weight (out,in),
    BatchNorm affine (gamma, beta) with default init (1, 0)."""
    params = {"conv": []}
    prev_c, L = channel, img_length
    for cur_c in hiddens:
        key, kw, kb = jax.random.split(key, 3)
        w = jax.random.normal(kw, (cur_c, prev_c, 3, 3), jnp.float32) * 0.1
        b = jax.random.normal(kb, (cur_c,), jnp.float32) * 0.01   # cancelled by BN mean
        gamma = jnp.ones((cur_c,), jnp.float32)
        beta = jnp.zeros((cur_c,), jnp.float32)
        params["conv"].append((w, b, gamma, beta))
        prev_c, L = cur_c, L // 2
    feat = prev_c * L * L
    key, k1, k2, k3, k4 = jax.random.split(key, 5)
    params["w_ez"] = jax.random.normal(k1, (c_dim, feat), jnp.float32) * 0.1
    params["b_ez"] = jax.random.normal(k2, (c_dim,), jnp.float32) * 0.01
    params["w_cy"] = jax.random.normal(k3, (y_dim, c_dim), jnp.float32) * 0.1
    params["b_cy"] = jax.random.normal(k4, (y_dim,), jnp.float32) * 0.01
    return params


def reference_forward(params, x):
    """Pure-JAX (XLA) reference of the PyTorch forward (training-mode BN stats)."""
    h = x.astype(jnp.float32)
    for (w, b, gamma, beta) in params["conv"]:
        h = jax.lax.conv_general_dilated(
            h, w, window_strides=(2, 2), padding=((1, 1), (1, 1)),
            dimension_numbers=("NCHW", "OIHW", "NCHW")) + b[None, :, None, None]
        mean = jnp.mean(h, axis=(0, 2, 3), keepdims=True)
        var = jnp.mean(jnp.square(h - mean), axis=(0, 2, 3), keepdims=True)
        h = (h - mean) * jax.lax.rsqrt(var + BN_EPS) * gamma[None, :, None, None] \
            + beta[None, :, None, None]
        h = jnp.maximum(h, NEG_SLOPE * h)
    e = h.reshape(h.shape[0], -1)
    z = e @ params["w_ez"].T + params["b_ez"]
    return z @ params["w_cy"].T + params["b_cy"]


# ----------------------------- main ------------------------------------------

if __name__ == "__main__":
    # 5 stride-2 conv stages need img_length divisible by 32; 64 -> final 2x2 map.
    batch = 2
    channel = 1
    img_length = 64
    hiddens = [4, 8, 8, 16, 16]
    c_dim = 18
    y_dim = 2

    key = jax.random.PRNGKey(0)
    key, kx, kp = jax.random.split(key, 3)
    x = jax.random.normal(kx, (batch, channel, img_length, img_length), jnp.float32)
    params = init_params(kp, channel, hiddens, img_length, c_dim, y_dim)

    const_inputs, stage_meta, head_meta = prepare_params(
        params, batch, channel, img_length, hiddens)
    forward = jax.jit(make_forward(stage_meta, head_meta, batch, channel,
                                   img_length, y_dim))
    y_pred = forward(const_inputs, x)
    jax.block_until_ready(y_pred)
    assert y_pred.shape == (batch, y_dim), y_pred.shape
    assert bool(jnp.all(jnp.isfinite(y_pred))), "non-finite output"

    # Sanity check vs a pure-JAX reference (loose tolerance: conv GEMMs run bf16-in/f32-acc).
    y_ref = reference_forward(params, x)
    err = float(jnp.max(jnp.abs(y_pred - y_ref)))
    assert err < 0.2, f"kernel/reference mismatch: max abs err = {err}"
    print("KERNEL_OK")
</pallas_src>

<mosaic_0001>
module attributes {stable_mosaic.version = 11 : i64} {
  func.func @kernel(%arg0: memref<128x64xf32, #tpu.memory_space<vmem>>, %arg1: memref<192x128xbf16, #tpu.memory_space<vmem>>, %arg2: memref<64x1xf32, #tpu.memory_space<vmem>>, %arg3: memref<128x4xf32, #tpu.memory_space<vmem>>, %arg4: memref<4x128xf32, #tpu.memory_space<vmem>>, %arg5: memref<2x4xf32, #tpu.memory_space<vmem>>, %arg6: memref<384x128xbf16, #tpu.memory_space<vmem>>, %arg7: memref<32x1xf32, #tpu.memory_space<vmem>>, %arg8: memref<128x8xf32, #tpu.memory_space<vmem>>, %arg9: memref<8x128xf32, #tpu.memory_space<vmem>>, %arg10: memref<2x8xf32, #tpu.memory_space<vmem>>, %arg11: memref<384x64xbf16, #tpu.memory_space<vmem>>, %arg12: memref<16x1xf32, #tpu.memory_space<vmem>>, %arg13: memref<64x8xf32, #tpu.memory_space<vmem>>, %arg14: memref<8x64xf32, #tpu.memory_space<vmem>>, %arg15: memref<2x8xf32, #tpu.memory_space<vmem>>, %arg16: memref<192x64xbf16, #tpu.memory_space<vmem>>, %arg17: memref<8x1xf32, #tpu.memory_space<vmem>>, %arg18: memref<64x16xf32, #tpu.memory_space<vmem>>, %arg19: memref<16x64xf32, #tpu.memory_space<vmem>>, %arg20: memref<2x16xf32, #tpu.memory_space<vmem>>, %arg21: memref<192x32xbf16, #tpu.memory_space<vmem>>, %arg22: memref<4x1xf32, #tpu.memory_space<vmem>>, %arg23: memref<32x16xf32, #tpu.memory_space<vmem>>, %arg24: memref<16x32xf32, #tpu.memory_space<vmem>>, %arg25: memref<2x16xf32, #tpu.memory_space<vmem>>, %arg26: memref<64x2xf32, #tpu.memory_space<vmem>>, %arg27: memref<1x2xf32, #tpu.memory_space<vmem>>, %arg28: memref<2x2xf32, #tpu.memory_space<vmem>>, %arg29: memref<136x64xf32, #tpu.memory_space<vmem>>, %arg30: memref<72x128xf32, #tpu.memory_space<vmem>>, %arg31: memref<40x128xf32, #tpu.memory_space<vmem>>, %arg32: memref<24x64xf32, #tpu.memory_space<vmem>>, %arg33: memref<16x64xf32, #tpu.memory_space<vmem>>, %arg34: memref<4x32xf32, #tpu.memory_space<vmem>>) attributes {dimension_semantics = [], scalar_prefetch = 0 : i64, scratch_operands = 6 : i64, tpu.core_type = #tpu.core_type<tc>} {
    %c0 = arith.constant 0 : index
    %c0_0 = arith.constant 0 : index
    %0 = vector.load %arg0[%c0, %c0_0] : memref<128x64xf32, #tpu.memory_space<vmem>>, vector<128x64xf32>
    %cst = arith.constant 0.000000e+00 : f32
    %1 = vector.broadcast %cst : f32 to vector<8x64xf32>
    %c0_1 = arith.constant 0 : index
    %c0_2 = arith.constant 0 : index
    %2 = vector.load %arg29[%c0_1, %c0_2] : memref<136x64xf32, #tpu.memory_space<vmem>>, vector<8x64xf32>
    tpu.vector_store %arg29[%c0_1, %c0_2], %1 {strides = array<i32>} : memref<136x64xf32, #tpu.memory_space<vmem>>, vector<8x64xf32>,
    %c8 = arith.constant 8 : index
    %c0_3 = arith.constant 0 : index
    %3 = vector.load %arg29[%c8, %c0_3] : memref<136x64xf32, #tpu.memory_space<vmem>>, vector<128x64xf32>
    tpu.vector_store %arg29[%c8, %c0_3], %0 {strides = array<i32>} : memref<136x64xf32, #tpu.memory_space<vmem>>, vector<128x64xf32>,
    %c7 = arith.constant 7 : index
    %c0_4 = arith.constant 0 : index
    %4 = tpu.strided_load %arg29[%c7, %c0_4] {strides = array<i32: 2, 1>} : memref<136x64xf32, #tpu.memory_space<vmem>>, vector<64x64xf32>
    %c0_5 = arith.constant 0 : index
    %c0_6 = arith.constant 0 : index
    %5 = vector.load %arg2[%c0_5, %c0_6] : memref<64x1xf32, #tpu.memory_space<vmem>>, vector<64x1xf32>
    %6 = vector.broadcast %5 : vector<64x1xf32> to vector<64x64xf32>
    %7 = arith.mulf %4, %6 : vector<64x64xf32>
    %c8_7 = arith.constant 8 : index
    %c0_8 = arith.constant 0 : index
    %8 = tpu.strided_load %arg29[%c8_7, %c0_8] {strides = array<i32: 2, 1>} : memref<136x64xf32, #tpu.memory_space<vmem>>, vector<64x64xf32>
    %c9 = arith.constant 9 : index
    %c0_9 = arith.constant 0 : index
    %9 = tpu.strided_load %arg29[%c9, %c0_9] {strides = array<i32: 2, 1>} : memref<136x64xf32, #tpu.memory_space<vmem>>, vector<64x64xf32>
    %10 = tpu.concatenate %7, %8, %9 in 1 : vector<64x64xf32>, vector<64x64xf32>, vector<64x64xf32> -> vector<64x192xf32>
    %11 = arith.truncf %10 : vector<64x192xf32> to vector<64x192xbf16>
    %c0_10 = arith.constant 0 : index
    %c0_11 = arith.constant 0 : index
    %12 = vector.load %arg1[%c0_10, %c0_11] : memref<192x128xbf16, #tpu.memory_space<vmem>>, vector<192x128xbf16>
    %cst_12 = arith.constant dense<0.000000e+00> : vector<64x128xf32>
    %13 = tpu.matmul %11, %12, %cst_12 {dimension_numbers = #tpu.dot_dimension_numbers<[1], [0], [0], [1], [0, 0, 1, 1], [], []>} : vector<64x192xbf16>, vector<192x128xbf16>, vector<64x128xf32> -> vector<64x128xf32>
    %cst_13 = arith.constant dense<0.000000e+00> : vector<128xf32>
    %14 = vector.multi_reduction <add>, %13, %cst_13 [0] : vector<64x128xf32> to vector<128xf32>
    %15 = vector.shape_cast %14 : vector<128xf32> to vector<1x128xf32>
    %16 = arith.mulf %13, %13 : vector<64x128xf32>
    %cst_14 = arith.constant dense<0.000000e+00> : vector<128xf32>
    %17 = vector.multi_reduction <add>, %16, %cst_14 [0] : vector<64x128xf32> to vector<128xf32>
    %18 = vector.shape_cast %17 : vector<128xf32> to vector<1x128xf32>
    %19 = tpu.concatenate %15, %18 in 0 : vector<1x128xf32>, vector<1x128xf32> -> vector<2x128xf32>
    %c0_15 = arith.constant 0 : index
    %c0_16 = arith.constant 0 : index
    %20 = vector.load %arg3[%c0_15, %c0_16] : memref<128x4xf32, #tpu.memory_space<vmem>>, vector<128x4xf32>
    %cst_17 = arith.constant dense<0.000000e+00> : vector<2x4xf32>
    %21 = tpu.matmul %19, %20, %cst_17 {dimension_numbers = #tpu.dot_dimension_numbers<[1], [0], [0], [1], [0, 0, 1, 1], [], []>} : vector<2x128xf32>, vector<128x4xf32>, vector<2x4xf32> -> vector<2x4xf32>
    %22 = vector.extract_strided_slice %21 {offsets = [0, 0], sizes = [1, 4], strides = [1, 1]} : vector<2x4xf32> to vector<1x4xf32>
    %23 = vector.extract_strided_slice %21 {offsets = [1, 0], sizes = [1, 4], strides = [1, 1]} : vector<2x4xf32> to vector<1x4xf32>
    %24 = arith.mulf %22, %22 : vector<1x4xf32>
    %25 = arith.subf %23, %24 : vector<1x4xf32>
    %c0_18 = arith.constant 0 : index
    %c0_19 = arith.constant 0 : index
    %26 = vector.load %arg5[%c0_18, %c0_19] : memref<2x4xf32, #tpu.memory_space<vmem>>, vector<2x4xf32>
    %27 = vector.extract_strided_slice %26 {offsets = [0, 0], sizes = [1, 4], strides = [1, 1]} : vector<2x4xf32> to vector<1x4xf32>
    %cst_20 = arith.constant 9.99999974E-6 : f32
    %28 = vector.broadcast %cst_20 : f32 to vector<1x4xf32>
    %29 = arith.addf %25, %28 : vector<1x4xf32>
    %30 = math.rsqrt %29 : vector<1x4xf32>
    %31 = arith.mulf %27, %30 : vector<1x4xf32>
    %32 = vector.extract_strided_slice %26 {offsets = [1, 0], sizes = [1, 4], strides = [1, 1]} : vector<2x4xf32> to vector<1x4xf32>
    %33 = arith.mulf %22, %31 : vector<1x4xf32>
    %34 = arith.subf %32, %33 : vector<1x4xf32>
    %35 = tpu.concatenate %31, %34 in 0 : vector<1x4xf32>, vector<1x4xf32> -> vector<2x4xf32>
    %c0_21 = arith.constant 0 : index
    %c0_22 = arith.constant 0 : index
    %36 = vector.load %arg4[%c0_21, %c0_22] : memref<4x128xf32, #tpu.memory_space<vmem>>, vector<4x128xf32>
    %cst_23 = arith.constant dense<0.000000e+00> : vector<2x128xf32>
    %37 = tpu.matmul %35, %36, %cst_23 {dimension_numbers = #tpu.dot_dimension_numbers<[1], [0], [0], [1], [0, 0, 1, 1], [], []>} : vector<2x4xf32>, vector<4x128xf32>, vector<2x128xf32> -> vector<2x128xf32>
    %38 = vector.extract_strided_slice %37 {offsets = [0, 0], sizes = [1, 128], strides = [1, 1]} : vector<2x128xf32> to vector<1x128xf32>
    %39 = vector.broadcast %38 : vector<1x128xf32> to vector<64x128xf32>
    %40 = arith.mulf %13, %39 : vector<64x128xf32>
    %41 = vector.extract_strided_slice %37 {offsets = [1, 0], sizes = [1, 128], strides = [1, 1]} : vector<2x128xf32> to vector<1x128xf32>
    %42 = vector.broadcast %41 : vector<1x128xf32> to vector<64x128xf32>
    %43 = arith.addf %40, %42 : vector<64x128xf32>
    %cst_24 = arith.constant 0.00999999977 : f32
    %44 = vector.broadcast %cst_24 : f32 to vector<64x128xf32>
    %45 = arith.mulf %44, %43 : vector<64x128xf32>
    %46 = arith.maximumf %43, %45 : vector<64x128xf32>
    %cst_25 = arith.constant 0.000000e+00 : f32
    %47 = vector.broadcast %cst_25 : f32 to vector<8x128xf32>
    %c0_26 = arith.constant 0 : index
    %c0_27 = arith.constant 0 : index
    %48 = vector.load %arg30[%c0_26, %c0_27] : memref<72x128xf32, #tpu.memory_space<vmem>>, vector<8x128xf32>
    tpu.vector_store %arg30[%c0_26, %c0_27], %47 {strides = array<i32>} : memref<72x128xf32, #tpu.memory_space<vmem>>, vector<8x128xf32>,
    %c8_28 = arith.constant 8 : index
    %c0_29 = arith.constant 0 : index
    %49 = vector.load %arg30[%c8_28, %c0_29] : memref<72x128xf32, #tpu.memory_space<vmem>>, vector<64x128xf32>
    tpu.vector_store %arg30[%c8_28, %c0_29], %46 {strides = array<i32>} : memref<72x128xf32, #tpu.memory_space<vmem>>, vector<64x128xf32>,
    %c7_30 = arith.constant 7 : index
    %c0_31 = arith.constant 0 : index
    %50 = tpu.strided_load %arg30[%c7_30, %c0_31] {strides = array<i32: 2, 1>} : memref<72x128xf32, #tpu.memory_space<vmem>>, vector<32x128xf32>
    %c0_32 = arith.constant 0 : index
    %c0_33 = arith.constant 0 : index
    %51 = vector.load %arg7[%c0_32, %c0_33] : memref<32x1xf32, #tpu.memory_space<vmem>>, vector<32x1xf32>
    %52 = vector.broadcast %51 : vector<32x1xf32> to vector<32x128xf32>
    %53 = arith.mulf %50, %52 : vector<32x128xf32>
    %c8_34 = arith.constant 8 : index
    %c0_35 = arith.constant 0 : index
    %54 = tpu.strided_load %arg30[%c8_34, %c0_35] {strides = array<i32: 2, 1>} : memref<72x128xf32, #tpu.memory_space<vmem>>, vector<32x128xf32>
    %c9_36 = arith.constant 9 : index
    %c0_37 = arith.constant 0 : index
    %55 = tpu.strided_load %arg30[%c9_36, %c0_37] {strides = array<i32: 2, 1>} : memref<72x128xf32, #tpu.memory_space<vmem>>, vector<32x128xf32>
    %56 = tpu.concatenate %53, %54, %55 in 1 : vector<32x128xf32>, vector<32x128xf32>, vector<32x128xf32> -> vector<32x384xf32>
    %57 = arith.truncf %56 : vector<32x384xf32> to vector<32x384xbf16>
    %c0_38 = arith.constant 0 : index
    %c0_39 = arith.constant 0 : index
    %58 = vector.load %arg6[%c0_38, %c0_39] : memref<384x128xbf16, #tpu.memory_space<vmem>>, vector<384x128xbf16>
    %cst_40 = arith.constant dense<0.000000e+00> : vector<32x128xf32>
    %59 = tpu.matmul %57, %58, %cst_40 {dimension_numbers = #tpu.dot_dimension_numbers<[1], [0], [0], [1], [0, 0, 1, 1], [], []>} : vector<32x384xbf16>, vector<384x128xbf16>, vector<32x128xf32> -> vector<32x128xf32>
    %cst_41 = arith.constant dense<0.000000e+00> : vector<128xf32>
    %60 = vector.multi_reduction <add>, %59, %cst_41 [0] : vector<32x128xf32> to vector<128xf32>
    %61 = vector.shape_cast %60 : vector<128xf32> to vector<1x128xf32>
    %62 = arith.mulf %59, %59 : vector<32x128xf32>
    %cst_42 = arith.constant dense<0.000000e+00> : vector<128xf32>
    %63 = vector.multi_reduction <add>, %62, %cst_42 [0] : vector<32x128xf32> to vector<128xf32>
    %64 = vector.shape_cast %63 : vector<128xf32> to vector<1x128xf32>
    %65 = tpu.concatenate %61, %64 in 0 : vector<1x128xf32>, vector<1x128xf32> -> vector<2x128xf32>
    %c0_43 = arith.constant 0 : index
    %c0_44 = arith.constant 0 : index
    %66 = vector.load %arg8[%c0_43, %c0_44] : memref<128x8xf32, #tpu.memory_space<vmem>>, vector<128x8xf32>
    %cst_45 = arith.constant dense<0.000000e+00> : vector<2x8xf32>
    %67 = tpu.matmul %65, %66, %cst_45 {dimension_numbers = #tpu.dot_dimension_numbers<[1], [0], [0], [1], [0, 0, 1, 1], [], []>} : vector<2x128xf32>, vector<128x8xf32>, vector<2x8xf32> -> vector<2x8xf32>
    %68 = vector.extract_strided_slice %67 {offsets = [0, 0], sizes = [1, 8], strides = [1, 1]} : vector<2x8xf32> to vector<1x8xf32>
    %69 = vector.extract_strided_slice %67 {offsets = [1, 0], sizes = [1, 8], strides = [1, 1]} : vector<2x8xf32> to vector<1x8xf32>
    %70 = arith.mulf %68, %68 : vector<1x8xf32>
    %71 = arith.subf %69, %70 : vector<1x8xf32>
    %c0_46 = arith.constant 0 : index
    %c0_47 = arith.constant 0 : index
    %72 = vector.load %arg10[%c0_46, %c0_47] : memref<2x8xf32, #tpu.memory_space<vmem>>, vector<2x8xf32>
    %73 = vector.extract_strided_slice %72 {offsets = [0, 0], sizes = [1, 8], strides = [1, 1]} : vector<2x8xf32> to vector<1x8xf32>
    %cst_48 = arith.constant 9.99999974E-6 : f32
    %74 = vector.broadcast %cst_48 : f32 to vector<1x8xf32>
    %75 = arith.addf %71, %74 : vector<1x8xf32>
    %76 = math.rsqrt %75 : vector<1x8xf32>
    %77 = arith.mulf %73, %76 : vector<1x8xf32>
    %78 = vector.extract_strided_slice %72 {offsets = [1, 0], sizes = [1, 8], strides = [1, 1]} : vector<2x8xf32> to vector<1x8xf32>
    %79 = arith.mulf %68, %77 : vector<1x8xf32>
    %80 = arith.subf %78, %79 : vector<1x8xf32>
    %81 = tpu.concatenate %77, %80 in 0 : vector<1x8xf32>, vector<1x8xf32> -> vector<2x8xf32>
    %c0_49 = arith.constant 0 : index
    %c0_50 = arith.constant 0 : index
    %82 = vector.load %arg9[%c0_49, %c0_50] : memref<8x128xf32, #tpu.memory_space<vmem>>, vector<8x128xf32>
    %cst_51 = arith.constant dense<0.000000e+00> : vector<2x128xf32>
    %83 = tpu.matmul %81, %82, %cst_51 {dimension_numbers = #tpu.dot_dimension_numbers<[1], [0], [0], [1], [0, 0, 1, 1], [], []>} : vector<2x8xf32>, vector<8x128xf32>, vector<2x128xf32> -> vector<2x128xf32>
    %84 = vector.extract_strided_slice %83 {offsets = [0, 0], sizes = [1, 128], strides = [1, 1]} : vector<2x128xf32> to vector<1x128xf32>
    %85 = vector.broadcast %84 : vector<1x128xf32> to vector<32x128xf32>
    %86 = arith.mulf %59, %85 : vector<32x128xf32>
    %87 = vector.extract_strided_slice %83 {offsets = [1, 0], sizes = [1, 128], strides = [1, 1]} : vector<2x128xf32> to vector<1x128xf32>
    %88 = vector.broadcast %87 : vector<1x128xf32> to vector<32x128xf32>
    %89 = arith.addf %86, %88 : vector<32x128xf32>
    %cst_52 = arith.constant 0.00999999977 : f32
    %90 = vector.broadcast %cst_52 : f32 to vector<32x128xf32>
    %91 = arith.mulf %90, %89 : vector<32x128xf32>
    %92 = arith.maximumf %89, %91 : vector<32x128xf32>
    %cst_53 = arith.constant 0.000000e+00 : f32
    %93 = vector.broadcast %cst_53 : f32 to vector<8x128xf32>
    %c0_54 = arith.constant 0 : index
    %c0_55 = arith.constant 0 : index
    %94 = vector.load %arg31[%c0_54, %c0_55] : memref<40x128xf32, #tpu.memory_space<vmem>>, vector<8x128xf32>
    tpu.vector_store %arg31[%c0_54, %c0_55], %93 {strides = array<i32>} : memref<40x128xf32, #tpu.memory_space<vmem>>, vector<8x128xf32>,
    %c8_56 = arith.constant 8 : index
    %c0_57 = arith.constant 0 : index
    %95 = vector.load %arg31[%c8_56, %c0_57] : memref<40x128xf32, #tpu.memory_space<vmem>>, vector<32x128xf32>
    tpu.vector_store %arg31[%c8_56, %c0_57], %92 {strides = array<i32>} : memref<40x128xf32, #tpu.memory_space<vmem>>, vector<32x128xf32>,
    %c7_58 = arith.constant 7 : index
    %c0_59 = arith.constant 0 : index
    %96 = tpu.strided_load %arg31[%c7_58, %c0_59] {strides = array<i32: 2, 1>} : memref<40x128xf32, #tpu.memory_space<vmem>>, vector<16x128xf32>
    %c0_60 = arith.constant 0 : index
    %c0_61 = arith.constant 0 : index
    %97 = vector.load %arg12[%c0_60, %c0_61] : memref<16x1xf32, #tpu.memory_space<vmem>>, vector<16x1xf32>
    %98 = vector.broadcast %97 : vector<16x1xf32> to vector<16x128xf32>
    %99 = arith.mulf %96, %98 : vector<16x128xf32>
    %c8_62 = arith.constant 8 : index
    %c0_63 = arith.constant 0 : index
    %100 = tpu.strided_load %arg31[%c8_62, %c0_63] {strides = array<i32: 2, 1>} : memref<40x128xf32, #tpu.memory_space<vmem>>, vector<16x128xf32>
    %c9_64 = arith.constant 9 : index
    %c0_65 = arith.constant 0 : index
    %101 = tpu.strided_load %arg31[%c9_64, %c0_65] {strides = array<i32: 2, 1>} : memref<40x128xf32, #tpu.memory_space<vmem>>, vector<16x128xf32>
    %102 = tpu.concatenate %99, %100, %101 in 1 : vector<16x128xf32>, vector<16x128xf32>, vector<16x128xf32> -> vector<16x384xf32>
    %103 = arith.truncf %102 : vector<16x384xf32> to vector<16x384xbf16>
    %c0_66 = arith.constant 0 : index
    %c0_67 = arith.constant 0 : index
    %104 = vector.load %arg11[%c0_66, %c0_67] : memref<384x64xbf16, #tpu.memory_space<vmem>>, vector<384x64xbf16>
    %cst_68 = arith.constant dense<0.000000e+00> : vector<16x64xf32>
    %105 = tpu.matmul %103, %104, %cst_68 {dimension_numbers = #tpu.dot_dimension_numbers<[1], [0], [0], [1], [0, 0, 1, 1], [], []>} : vector<16x384xbf16>, vector<384x64xbf16>, vector<16x64xf32> -> vector<16x64xf32>
    %cst_69 = arith.constant dense<0.000000e+00> : vector<64xf32>
    %106 = vector.multi_reduction <add>, %105, %cst_69 [0] : vector<16x64xf32> to vector<64xf32>
    %107 = vector.shape_cast %106 : vector<64xf32> to vector<1x64xf32>
    %108 = arith.mulf %105, %105 : vector<16x64xf32>
    %cst_70 = arith.constant dense<0.000000e+00> : vector<64xf32>
    %109 = vector.multi_reduction <add>, %108, %cst_70 [0] : vector<16x64xf32> to vector<64xf32>
    %110 = vector.shape_cast %109 : vector<64xf32> to vector<1x64xf32>
    %111 = tpu.concatenate %107, %110 in 0 : vector<1x64xf32>, vector<1x64xf32> -> vector<2x64xf32>
    %c0_71 = arith.constant 0 : index
    %c0_72 = arith.constant 0 : index
    %112 = vector.load %arg13[%c0_71, %c0_72] : memref<64x8xf32, #tpu.memory_space<vmem>>, vector<64x8xf32>
    %cst_73 = arith.constant dense<0.000000e+00> : vector<2x8xf32>
    %113 = tpu.matmul %111, %112, %cst_73 {dimension_numbers = #tpu.dot_dimension_numbers<[1], [0], [0], [1], [0, 0, 1, 1], [], []>} : vector<2x64xf32>, vector<64x8xf32>, vector<2x8xf32> -> vector<2x8xf32>
    %114 = vector.extract_strided_slice %113 {offsets = [0, 0], sizes = [1, 8], strides = [1, 1]} : vector<2x8xf32> to vector<1x8xf32>
    %115 = vector.extract_strided_slice %113 {offsets = [1, 0], sizes = [1, 8], strides = [1, 1]} : vector<2x8xf32> to vector<1x8xf32>
    %116 = arith.mulf %114, %114 : vector<1x8xf32>
    %117 = arith.subf %115, %116 : vector<1x8xf32>
    %c0_74 = arith.constant 0 : index
    %c0_75 = arith.constant 0 : index
    %118 = vector.load %arg15[%c0_74, %c0_75] : memref<2x8xf32, #tpu.memory_space<vmem>>, vector<2x8xf32>
    %119 = vector.extract_strided_slice %118 {offsets = [0, 0], sizes = [1, 8], strides = [1, 1]} : vector<2x8xf32> to vector<1x8xf32>
    %cst_76 = arith.constant 9.99999974E-6 : f32
    %120 = vector.broadcast %cst_76 : f32 to vector<1x8xf32>
    %121 = arith.addf %117, %120 : vector<1x8xf32>
    %122 = math.rsqrt %121 : vector<1x8xf32>
    %123 = arith.mulf %119, %122 : vector<1x8xf32>
    %124 = vector.extract_strided_slice %118 {offsets = [1, 0], sizes = [1, 8], strides = [1, 1]} : vector<2x8xf32> to vector<1x8xf32>
    %125 = arith.mulf %114, %123 : vector<1x8xf32>
    %126 = arith.subf %124, %125 : vector<1x8xf32>
    %127 = tpu.concatenate %123, %126 in 0 : vector<1x8xf32>, vector<1x8xf32> -> vector<2x8xf32>
    %c0_77 = arith.constant 0 : index
    %c0_78 = arith.constant 0 : index
    %128 = vector.load %arg14[%c0_77, %c0_78] : memref<8x64xf32, #tpu.memory_space<vmem>>, vector<8x64xf32>
    %cst_79 = arith.constant dense<0.000000e+00> : vector<2x64xf32>
    %129 = tpu.matmul %127, %128, %cst_79 {dimension_numbers = #tpu.dot_dimension_numbers<[1], [0], [0], [1], [0, 0, 1, 1], [], []>} : vector<2x8xf32>, vector<8x64xf32>, vector<2x64xf32> -> vector<2x64xf32>
    %130 = vector.extract_strided_slice %129 {offsets = [0, 0], sizes = [1, 64], strides = [1, 1]} : vector<2x64xf32> to vector<1x64xf32>
    %131 = vector.broadcast %130 : vector<1x64xf32> to vector<16x64xf32>
    %132 = arith.mulf %105, %131 : vector<16x64xf32>
    %133 = vector.extract_strided_slice %129 {offsets = [1, 0], sizes = [1, 64], strides = [1, 1]} : vector<2x64xf32> to vector<1x64xf32>
    %134 = vector.broadcast %133 : vector<1x64xf32> to vector<16x64xf32>
    %135 = arith.addf %132, %134 : vector<16x64xf32>
    %cst_80 = arith.constant 0.00999999977 : f32
    %136 = vector.broadcast %cst_80 : f32 to vector<16x64xf32>
    %137 = arith.mulf %136, %135 : vector<16x64xf32>
    %138 = arith.maximumf %135, %137 : vector<16x64xf32>
    %cst_81 = arith.constant 0.000000e+00 : f32
    %139 = vector.broadcast %cst_81 : f32 to vector<8x64xf32>
    %c0_82 = arith.constant 0 : index
    %c0_83 = arith.constant 0 : index
    %140 = vector.load %arg32[%c0_82, %c0_83] : memref<24x64xf32, #tpu.memory_space<vmem>>, vector<8x64xf32>
    tpu.vector_store %arg32[%c0_82, %c0_83], %139 {strides = array<i32>} : memref<24x64xf32, #tpu.memory_space<vmem>>, vector<8x64xf32>,
    %c8_84 = arith.constant 8 : index
    %c0_85 = arith.constant 0 : index
    %141 = vector.load %arg32[%c8_84, %c0_85] : memref<24x64xf32, #tpu.memory_space<vmem>>, vector<16x64xf32>
    tpu.vector_store %arg32[%c8_84, %c0_85], %138 {strides = array<i32>} : memref<24x64xf32, #tpu.memory_space<vmem>>, vector<16x64xf32>,
    %c7_86 = arith.constant 7 : index
    %c0_87 = arith.constant 0 : index
    %142 = tpu.strided_load %arg32[%c7_86, %c0_87] {strides = array<i32: 2, 1>} : memref<24x64xf32, #tpu.memory_space<vmem>>, vector<8x64xf32>
    %c0_88 = arith.constant 0 : index
    %c0_89 = arith.constant 0 : index
    %143 = vector.load %arg17[%c0_88, %c0_89] : memref<8x1xf32, #tpu.memory_space<vmem>>, vector<8x1xf32>
    %144 = vector.broadcast %143 : vector<8x1xf32> to vector<8x64xf32>
    %145 = arith.mulf %142, %144 : vector<8x64xf32>
    %c8_90 = arith.constant 8 : index
    %c0_91 = arith.constant 0 : index
    %146 = tpu.strided_load %arg32[%c8_90, %c0_91] {strides = array<i32: 2, 1>} : memref<24x64xf32, #tpu.memory_space<vmem>>, vector<8x64xf32>
    %c9_92 = arith.constant 9 : index
    %c0_93 = arith.constant 0 : index
    %147 = tpu.strided_load %arg32[%c9_92, %c0_93] {strides = array<i32: 2, 1>} : memref<24x64xf32, #tpu.memory_space<vmem>>, vector<8x64xf32>
    %148 = tpu.concatenate %145, %146, %147 in 1 : vector<8x64xf32>, vector<8x64xf32>, vector<8x64xf32> -> vector<8x192xf32>
    %149 = arith.truncf %148 : vector<8x192xf32> to vector<8x192xbf16>
    %c0_94 = arith.constant 0 : index
    %c0_95 = arith.constant 0 : index
    %150 = vector.load %arg16[%c0_94, %c0_95] : memref<192x64xbf16, #tpu.memory_space<vmem>>, vector<192x64xbf16>
    %cst_96 = arith.constant dense<0.000000e+00> : vector<8x64xf32>
    %151 = tpu.matmul %149, %150, %cst_96 {dimension_numbers = #tpu.dot_dimension_numbers<[1], [0], [0], [1], [0, 0, 1, 1], [], []>} : vector<8x192xbf16>, vector<192x64xbf16>, vector<8x64xf32> -> vector<8x64xf32>
    %cst_97 = arith.constant dense<0.000000e+00> : vector<64xf32>
    %152 = vector.multi_reduction <add>, %151, %cst_97 [0] : vector<8x64xf32> to vector<64xf32>
    %153 = vector.shape_cast %152 : vector<64xf32> to vector<1x64xf32>
    %154 = arith.mulf %151, %151 : vector<8x64xf32>
    %cst_98 = arith.constant dense<0.000000e+00> : vector<64xf32>
    %155 = vector.multi_reduction <add>, %154, %cst_98 [0] : vector<8x64xf32> to vector<64xf32>
    %156 = vector.shape_cast %155 : vector<64xf32> to vector<1x64xf32>
    %157 = tpu.concatenate %153, %156 in 0 : vector<1x64xf32>, vector<1x64xf32> -> vector<2x64xf32>
    %c0_99 = arith.constant 0 : index
    %c0_100 = arith.constant 0 : index
    %158 = vector.load %arg18[%c0_99, %c0_100] : memref<64x16xf32, #tpu.memory_space<vmem>>, vector<64x16xf32>
    %cst_101 = arith.constant dense<0.000000e+00> : vector<2x16xf32>
    %159 = tpu.matmul %157, %158, %cst_101 {dimension_numbers = #tpu.dot_dimension_numbers<[1], [0], [0], [1], [0, 0, 1, 1], [], []>} : vector<2x64xf32>, vector<64x16xf32>, vector<2x16xf32> -> vector<2x16xf32>
    %160 = vector.extract_strided_slice %159 {offsets = [0, 0], sizes = [1, 16], strides = [1, 1]} : vector<2x16xf32> to vector<1x16xf32>
    %161 = vector.extract_strided_slice %159 {offsets = [1, 0], sizes = [1, 16], strides = [1, 1]} : vector<2x16xf32> to vector<1x16xf32>
    %162 = arith.mulf %160, %160 : vector<1x16xf32>
    %163 = arith.subf %161, %162 : vector<1x16xf32>
    %c0_102 = arith.constant 0 : index
    %c0_103 = arith.constant 0 : index
    %164 = vector.load %arg20[%c0_102, %c0_103] : memref<2x16xf32, #tpu.memory_space<vmem>>, vector<2x16xf32>
    %165 = vector.extract_strided_slice %164 {offsets = [0, 0], sizes = [1, 16], strides = [1, 1]} : vector<2x16xf32> to vector<1x16xf32>
    %cst_104 = arith.constant 9.99999974E-6 : f32
    %166 = vector.broadcast %cst_104 : f32 to vector<1x16xf32>
    %167 = arith.addf %163, %166 : vector<1x16xf32>
    %168 = math.rsqrt %167 : vector<1x16xf32>
    %169 = arith.mulf %165, %168 : vector<1x16xf32>
    %170 = vector.extract_strided_slice %164 {offsets = [1, 0], sizes = [1, 16], strides = [1, 1]} : vector<2x16xf32> to vector<1x16xf32>
    %171 = arith.mulf %160, %169 : vector<1x16xf32>
    %172 = arith.subf %170, %171 : vector<1x16xf32>
    %173 = tpu.concatenate %169, %172 in 0 : vector<1x16xf32>, vector<1x16xf32> -> vector<2x16xf32>
    %c0_105 = arith.constant 0 : index
    %c0_106 = arith.constant 0 : index
    %174 = vector.load %arg19[%c0_105, %c0_106] : memref<16x64xf32, #tpu.memory_space<vmem>>, vector<16x64xf32>
    %cst_107 = arith.constant dense<0.000000e+00> : vector<2x64xf32>
    %175 = tpu.matmul %173, %174, %cst_107 {dimension_numbers = #tpu.dot_dimension_numbers<[1], [0], [0], [1], [0, 0, 1, 1], [], []>} : vector<2x16xf32>, vector<16x64xf32>, vector<2x64xf32> -> vector<2x64xf32>
    %176 = vector.extract_strided_slice %175 {offsets = [0, 0], sizes = [1, 64], strides = [1, 1]} : vector<2x64xf32> to vector<1x64xf32>
    %177 = vector.broadcast %176 : vector<1x64xf32> to vector<8x64xf32>
    %178 = arith.mulf %151, %177 : vector<8x64xf32>
    %179 = vector.extract_strided_slice %175 {offsets = [1, 0], sizes = [1, 64], strides = [1, 1]} : vector<2x64xf32> to vector<1x64xf32>
    %180 = vector.broadcast %179 : vector<1x64xf32> to vector<8x64xf32>
    %181 = arith.addf %178, %180 : vector<8x64xf32>
    %cst_108 = arith.constant 0.00999999977 : f32
    %182 = vector.broadcast %cst_108 : f32 to vector<8x64xf32>
    %183 = arith.mulf %182, %181 : vector<8x64xf32>
    %184 = arith.maximumf %181, %183 : vector<8x64xf32>
    %cst_109 = arith.constant 0.000000e+00 : f32
    %185 = vector.broadcast %cst_109 : f32 to vector<8x64xf32>
    %c0_110 = arith.constant 0 : index
    %c0_111 = arith.constant 0 : index
    %186 = vector.load %arg33[%c0_110, %c0_111] : memref<16x64xf32, #tpu.memory_space<vmem>>, vector<8x64xf32>
    tpu.vector_store %arg33[%c0_110, %c0_111], %185 {strides = array<i32>} : memref<16x64xf32, #tpu.memory_space<vmem>>, vector<8x64xf32>,
    %c8_112 = arith.constant 8 : index
    %c0_113 = arith.constant 0 : index
    %187 = vector.load %arg33[%c8_112, %c0_113] : memref<16x64xf32, #tpu.memory_space<vmem>>, vector<8x64xf32>
    tpu.vector_store %arg33[%c8_112, %c0_113], %184 {strides = array<i32>} : memref<16x64xf32, #tpu.memory_space<vmem>>, vector<8x64xf32>,
    %c7_114 = arith.constant 7 : index
    %c0_115 = arith.constant 0 : index
    %188 = tpu.strided_load %arg33[%c7_114, %c0_115] {strides = array<i32: 2, 1>} : memref<16x64xf32, #tpu.memory_space<vmem>>, vector<4x64xf32>
    %c0_116 = arith.constant 0 : index
    %c0_117 = arith.constant 0 : index
    %189 = vector.load %arg22[%c0_116, %c0_117] : memref<4x1xf32, #tpu.memory_space<vmem>>, vector<4x1xf32>
    %190 = vector.broadcast %189 : vector<4x1xf32> to vector<4x64xf32>
    %191 = arith.mulf %188, %190 : vector<4x64xf32>
    %c8_118 = arith.constant 8 : index
    %c0_119 = arith.constant 0 : index
    %192 = tpu.strided_load %arg33[%c8_118, %c0_119] {strides = array<i32: 2, 1>} : memref<16x64xf32, #tpu.memory_space<vmem>>, vector<4x64xf32>
    %c9_120 = arith.constant 9 : index
    %c0_121 = arith.constant 0 : index
    %193 = tpu.strided_load %arg33[%c9_120, %c0_121] {strides = array<i32: 2, 1>} : memref<16x64xf32, #tpu.memory_space<vmem>>, vector<4x64xf32>
    %194 = tpu.concatenate %191, %192, %193 in 1 : vector<4x64xf32>, vector<4x64xf32>, vector<4x64xf32> -> vector<4x192xf32>
    %195 = arith.truncf %194 : vector<4x192xf32> to vector<4x192xbf16>
    %c0_122 = arith.constant 0 : index
    %c0_123 = arith.constant 0 : index
    %196 = vector.load %arg21[%c0_122, %c0_123] : memref<192x32xbf16, #tpu.memory_space<vmem>>, vector<192x32xbf16>
    %cst_124 = arith.constant dense<0.000000e+00> : vector<4x32xf32>
    %197 = tpu.matmul %195, %196, %cst_124 {dimension_numbers = #tpu.dot_dimension_numbers<[1], [0], [0], [1], [0, 0, 1, 1], [], []>} : vector<4x192xbf16>, vector<192x32xbf16>, vector<4x32xf32> -> vector<4x32xf32>
    %cst_125 = arith.constant dense<0.000000e+00> : vector<32xf32>
    %198 = vector.multi_reduction <add>, %197, %cst_125 [0] : vector<4x32xf32> to vector<32xf32>
    %199 = vector.shape_cast %198 : vector<32xf32> to vector<1x32xf32>
    %200 = arith.mulf %197, %197 : vector<4x32xf32>
    %cst_126 = arith.constant dense<0.000000e+00> : vector<32xf32>
    %201 = vector.multi_reduction <add>, %200, %cst_126 [0] : vector<4x32xf32> to vector<32xf32>
    %202 = vector.shape_cast %201 : vector<32xf32> to vector<1x32xf32>
    %203 = tpu.concatenate %199, %202 in 0 : vector<1x32xf32>, vector<1x32xf32> -> vector<2x32xf32>
    %c0_127 = arith.constant 0 : index
    %c0_128 = arith.constant 0 : index
    %204 = vector.load %arg23[%c0_127, %c0_128] : memref<32x16xf32, #tpu.memory_space<vmem>>, vector<32x16xf32>
    %cst_129 = arith.constant dense<0.000000e+00> : vector<2x16xf32>
    %205 = tpu.matmul %203, %204, %cst_129 {dimension_numbers = #tpu.dot_dimension_numbers<[1], [0], [0], [1], [0, 0, 1, 1], [], []>} : vector<2x32xf32>, vector<32x16xf32>, vector<2x16xf32> -> vector<2x16xf32>
    %206 = vector.extract_strided_slice %205 {offsets = [0, 0], sizes = [1, 16], strides = [1, 1]} : vector<2x16xf32> to vector<1x16xf32>
    %207 = vector.extract_strided_slice %205 {offsets = [1, 0], sizes = [1, 16], strides = [1, 1]} : vector<2x16xf32> to vector<1x16xf32>
    %208 = arith.mulf %206, %206 : vector<1x16xf32>
    %209 = arith.subf %207, %208 : vector<1x16xf32>
    %c0_130 = arith.constant 0 : index
    %c0_131 = arith.constant 0 : index
    %210 = vector.load %arg25[%c0_130, %c0_131] : memref<2x16xf32, #tpu.memory_space<vmem>>, vector<2x16xf32>
    %211 = vector.extract_strided_slice %210 {offsets = [0, 0], sizes = [1, 16], strides = [1, 1]} : vector<2x16xf32> to vector<1x16xf32>
    %cst_132 = arith.constant 9.99999974E-6 : f32
    %212 = vector.broadcast %cst_132 : f32 to vector<1x16xf32>
    %213 = arith.addf %209, %212 : vector<1x16xf32>
    %214 = math.rsqrt %213 : vector<1x16xf32>
    %215 = arith.mulf %211, %214 : vector<1x16xf32>
    %216 = vector.extract_strided_slice %210 {offsets = [1, 0], sizes = [1, 16], strides = [1, 1]} : vector<2x16xf32> to vector<1x16xf32>
    %217 = arith.mulf %206, %215 : vector<1x16xf32>
    %218 = arith.subf %216, %217 : vector<1x16xf32>
    %219 = tpu.concatenate %215, %218 in 0 : vector<1x16xf32>, vector<1x16xf32> -> vector<2x16xf32>
    %c0_133 = arith.constant 0 : index
    %c0_134 = arith.constant 0 : index
    %220 = vector.load %arg24[%c0_133, %c0_134] : memref<16x32xf32, #tpu.memory_space<vmem>>, vector<16x32xf32>
    %cst_135 = arith.constant dense<0.000000e+00> : vector<2x32xf32>
    %221 = tpu.matmul %219, %220, %cst_135 {dimension_numbers = #tpu.dot_dimension_numbers<[1], [0], [0], [1], [0, 0, 1, 1], [], []>} : vector<2x16xf32>, vector<16x32xf32>, vector<2x32xf32> -> vector<2x32xf32>
    %222 = vector.extract_strided_slice %221 {offsets = [0, 0], sizes = [1, 32], strides = [1, 1]} : vector<2x32xf32> to vector<1x32xf32>
    %223 = vector.broadcast %222 : vector<1x32xf32> to vector<4x32xf32>
    %224 = arith.mulf %197, %223 : vector<4x32xf32>
    %225 = vector.extract_strided_slice %221 {offsets = [1, 0], sizes = [1, 32], strides = [1, 1]} : vector<2x32xf32> to vector<1x32xf32>
    %226 = vector.broadcast %225 : vector<1x32xf32> to vector<4x32xf32>
    %227 = arith.addf %224, %226 : vector<4x32xf32>
    %cst_136 = arith.constant 0.00999999977 : f32
    %228 = vector.broadcast %cst_136 : f32 to vector<4x32xf32>
    %229 = arith.mulf %228, %227 : vector<4x32xf32>
    %230 = arith.maximumf %227, %229 : vector<4x32xf32>
    %c0_137 = arith.constant 0 : index
    %c0_138 = arith.constant 0 : index
    %231 = vector.load %arg34[%c0_137, %c0_138] : memref<4x32xf32, #tpu.memory_space<vmem>>, vector<4x32xf32>
    tpu.vector_store %arg34[%c0_137, %c0_138], %230 {strides = array<i32>} : memref<4x32xf32, #tpu.memory_space<vmem>>, vector<4x32xf32>,
    %c0_139 = arith.constant 0 : index
    %c0_140 = arith.constant 0 : index
    %232 = tpu.strided_load %arg34[%c0_139, %c0_140] {strides = array<i32: 2, 1>} : memref<4x32xf32, #tpu.memory_space<vmem>>, vector<2x32xf32>
    %c1 = arith.constant 1 : index
    %c0_141 = arith.constant 0 : index
    %233 = tpu.strided_load %arg34[%c1, %c0_141] {strides = array<i32: 2, 1>} : memref<4x32xf32, #tpu.memory_space<vmem>>, vector<2x32xf32>
    %234 = tpu.concatenate %232, %233 in 1 : vector<2x32xf32>, vector<2x32xf32> -> vector<2x64xf32>
    %c0_142 = arith.constant 0 : index
    %c0_143 = arith.constant 0 : index
    %235 = vector.load %arg26[%c0_142, %c0_143] : memref<64x2xf32, #tpu.memory_space<vmem>>, vector<64x2xf32>
    %cst_144 = arith.constant dense<0.000000e+00> : vector<2x2xf32>
    %236 = tpu.matmul %234, %235, %cst_144 {dimension_numbers = #tpu.dot_dimension_numbers<[1], [0], [0], [1], [0, 0, 1, 1], [], []>} : vector<2x64xf32>, vector<64x2xf32>, vector<2x2xf32> -> vector<2x2xf32>
    %c0_145 = arith.constant 0 : index
    %c0_146 = arith.constant 0 : index
    %237 = vector.load %arg27[%c0_145, %c0_146] : memref<1x2xf32, #tpu.memory_space<vmem>>, vector<1x2xf32>
    %238 = vector.broadcast %237 : vector<1x2xf32> to vector<2x2xf32>
    %239 = arith.addf %236, %238 : vector<2x2xf32>
    %c0_147 = arith.constant 0 : index
    %c0_148 = arith.constant 0 : index
    %240 = vector.load %arg28[%c0_147, %c0_148] : memref<2x2xf32, #tpu.memory_space<vmem>>, vector<2x2xf32>
    tpu.vector_store %arg28[%c0_147, %c0_148], %239 {strides = array<i32>} : memref<2x2xf32, #tpu.memory_space<vmem>>, vector<2x2xf32>,
    return
  }
}

</mosaic_0001>

<bundles_post_ra>
// kernel: forward.1
= control target key start
LH: loop header
LB: loop body
LE: loop exit
PB: predicated region body
PF: predicated region fallthrough
CT: control target
= control target key end

     0   :  { %s4372_s0 = inlined_call_operand.vmem [shape: f32[128,64], index: 0, kind: input, shape index: {}]   ;;  %s4373_s1 = inlined_call_operand.vmem [shape: bf16[192,128], index: 1, kind: input, shape index: {}]   ;;  %s4374_s2 = inlined_call_operand.vmem [shape: f32[64,1], index: 2, kind: input, shape index: {}]   ;;  %s4375_s3 = inlined_call_operand.vmem [shape: f32[128,4], index: 3, kind: input, shape index: {}]   ;;  %s4376_s4 = inlined_call_operand.vmem [shape: f32[4,128], index: 4, kind: input, shape index: {}]   ;;  %s4377_s5 = inlined_call_operand.vmem [shape: f32[2,4], index: 5, kind: input, shape index: {}]   ;;  %s4378_s6 = inlined_call_operand.vmem [shape: bf16[384,128], index: 6, kind: input, shape index: {}]   ;;  %s4379_s7 = inlined_call_operand.vmem [shape: f32[32,1], index: 7, kind: input, shape index: {}]   ;;  %s4380_s8 = inlined_call_operand.vmem [shape: f32[128,8], index: 8, kind: input, shape index: {}]   ;;  %s4381_s9 = inlined_call_operand.vmem [shape: f32[8,128], index: 9, kind: input, shape index: {}]   ;;  %s4382_s10 = inlined_call_operand.vmem [shape: f32[2,8], index: 10, kind: input, shape index: {}]   ;;  %s4383_s11 = inlined_call_operand.vmem [shape: bf16[384,64], index: 11, kind: input, shape index: {}]   ;;  %s4384_s12 = inlined_call_operand.vmem [shape: f32[16,1], index: 12, kind: input, shape index: {}]   ;;  %s4385_s13 = inlined_call_operand.vmem [shape: f32[64,8], index: 13, kind: input, shape index: {}]   ;;  %s4386_s14 = inlined_call_operand.vmem [shape: f32[8,64], index: 14, kind: input, shape index: {}]   ;;  %s4387_s15 = inlined_call_operand.vmem [shape: f32[2,8], index: 15, kind: input, shape index: {}]   ;;  %s4388_s16 = inlined_call_operand.vmem [shape: bf16[192,64], index: 16, kind: input, shape index: {}]   ;;  %s4389_s17 = inlined_call_operand.vmem [shape: f32[8,1], index: 17, kind: input, shape index: {}]   ;;  %s4390_s18 = inlined_call_operand.vmem [shape: f32[64,16], index: 18, kind: input, shape index: {}]   ;;  %s4391_s19 = inlined_call_operand.vmem [shape: f32[16,64], index: 19, kind: input, shape index: {}]   ;;  %s4392_s20 = inlined_call_operand.vmem [shape: f32[2,16], index: 20, kind: input, shape index: {}]   ;;  %s4393_s21 = inlined_call_operand.vmem [shape: bf16[192,32], index: 21, kind: input, shape index: {}]   ;;  %s4394_s22 = inlined_call_operand.vmem [shape: f32[4,1], index: 22, kind: input, shape index: {}]   ;;  %s4395_s23 = inlined_call_operand.vmem [shape: f32[32,16], index: 23, kind: input, shape index: {}]   ;;  %s4396_s24 = inlined_call_operand.vmem [shape: f32[16,32], index: 24, kind: input, shape index: {}]   ;;  %s4397_s25 = inlined_call_operand.vmem [shape: f32[2,16], index: 25, kind: input, shape index: {}]   ;;  %s4398_s26 = inlined_call_operand.vmem [shape: f32[64,2], index: 26, kind: input, shape index: {}]   ;;  %s4399_s27 = inlined_call_operand.vmem [shape: f32[1,2], index: 27, kind: input, shape index: {}]   ;;  %s4400_s28 = inlined_call_operand.hbm [shape: f32[2,2], index: 28, kind: output, shape index: {}]  }
   0x1   :  { %4410 = sst [smem:[#allocation11_spill]] %s4372_s0 }
   0x2   :  { %4411 = sst [smem:[#allocation12_spill]] %s4373_s1 }
   0x3   :  { %4412 = sst [smem:[#allocation13_spill]] %s4374_s2 }
   0x4   :  { %4413 = sst [smem:[#allocation14_spill]] %s4375_s3 }
   0x5   :  { %4414 = sst [smem:[#allocation15_spill]] %s4376_s4 }
   0x6   :  { %4415 = sst [smem:[#allocation16_spill]] %s4377_s5 }
   0x7   :  { %4416 = sst [smem:[#allocation17_spill]] %s4378_s6 }
   0x8   :  { %4417 = sst [smem:[#allocation18_spill]] %s4379_s7 }
   0x9   :  { %4418 = sst [smem:[#allocation19_spill]] %s4380_s8 }
   0xa   :  { %4419 = sst [smem:[#allocation20_spill]] %s4381_s9 }
   0xb   :  { %4420 = sst [smem:[#allocation21_spill]] %s4382_s10 }
   0xc   :  { %4421 = sst [smem:[#allocation22_spill]] %s4383_s11 }
   0xd   :  { %4422 = sst [smem:[#allocation23_spill]] %s4384_s12 }
   0xe   :  { %s4423_s9 = sld [smem:[#allocation13_spill]]  ;;  %vm107_vm0 = vcmask 523264   ;;  %v3349_v2 = vmov 0   ;;  %s4424_s7 = sld [smem:[#allocation11_spill]]  ;;  %v3350_v9 = vmov 0.0   ;;  %v1815_v54 = vld [vmem:[%s4389_s17] sm:$0xff] }
   0xf   :  { %3208 = vset.pattern.permute.xlu1 %v3349_v2  ;;  %3207 = vset.pattern.permute.xlu0 %v3349_v2  ;;  %108 = vst.msk [vmem:[#allocation2] sm:$0xff] %vm107_vm0, %v3350_v9  ;;  %709 = vst [vmem:[#allocation3] sm:$0xff] %v3350_v9  ;;  %s4425_s10 = sld [smem:[#allocation12_spill]]  ;;  %s3351_s0 = smov 64   ;;  %v2179_v56 = vld [vmem:[%s4394_s22] sm:$0xf] }
  0x10   :  { %1292 = vst [vmem:[#allocation4] sm:$0xff] %v3350_v9  ;;  %1810 = vst.msk [vmem:[#allocation5] sm:$0xff] %vm107_vm0, %v3350_v9  ;;  %385 = vmatprep.subr.bf16.mxu0 %v3349_v2  ;;  %s4426_s11 = sld [smem:[#allocation18_spill]]  ;;  %s4427_s29 = sld [smem:[#allocation23_spill]] }
  0x11   :  { %2175 = vst.msk [vmem:[#allocation6] sm:$0xff] %vm107_vm0, %v3350_v9 }
  0x14   :  { %v143_v0 = vld [vmem:[%s4423_s9 + $0x10] sm:$0xff]  ;;  %v141_v1 = vld [vmem:[%s4423_s9] sm:$0xff]  ;;  %v144_v3 = vld [vmem:[%s4423_s9 + $0x18] sm:$0xff] }
  0x15   :  { %v142_v4 = vld [vmem:[%s4423_s9 + $0x8] sm:$0xff]  ;;  %v91_v5 = vld [vmem:[%s4424_s7] sm:$0xff]  ;;  %161 = vperm.xlu1 %3208, %v143_v0   ;;  %151 = vperm.xlu0 %3207, %v141_v1   ;;  %v93_v7 = vld [vmem:[%s4424_s7 + $0x10] sm:$0xff] }
  0x16   :  { %v92_v6 = vld [vmem:[%s4424_s7 + $0x8] sm:$0xff]  ;;  %v94_v8 = vld [vmem:[%s4424_s7 + $0x18] sm:$0xff]  ;;  %109 = vst.msk [vmem:[#allocation2 + $0x8] sm:$0xff] %vm107_vm0, %v91_v5  ;;  %111 = vst.msk [vmem:[#allocation2 + $0x18] sm:$0xff] %vm107_vm0, %v93_v7 }
  0x17   :  { %110 = vst.msk [vmem:[#allocation2 + $0x10] sm:$0xff] %vm107_vm0, %v92_v6  ;;  %112 = vst.msk [vmem:[#allocation2 + $0x20] sm:$0xff] %vm107_vm0, %v94_v8  ;;  %v95_v10 = vld [vmem:[%s4424_s7 + $0x20] sm:$0xff]  ;;  %v96_v11 = vld [vmem:[%s4424_s7 + $0x28] sm:$0xff] }
  0x18   :  { %v97_v12 = vld [vmem:[%s4424_s7 + $0x30] sm:$0xff]  ;;  %v98_v13 = vld [vmem:[%s4424_s7 + $0x38] sm:$0xff]  ;;  %113 = vst.msk [vmem:[#allocation2 + $0x28] sm:$0xff] %vm107_vm0, %v95_v10  ;;  %114 = vst.msk [vmem:[#allocation2 + $0x30] sm:$0xff] %vm107_vm0, %v96_v11 }
  0x19   :  { %115 = vst.msk [vmem:[#allocation2 + $0x38] sm:$0xff] %vm107_vm0, %v97_v12  ;;  %v145_v14 = vld [vmem:[%s4423_s9 + $0x20] sm:$0xff]  ;;  %116 = vst.msk [vmem:[#allocation2 + $0x40] sm:$0xff] %vm107_vm0, %v98_v13  ;;  %v104_v16 = vld [vmem:[%s4424_s7 + $0x68] sm:$0xff]  ;;  %166 = vperm.xlu1 %3208, %v144_v3   ;;  %156 = vperm.xlu0 %3207, %v142_v4  }
  0x1a   :  { %v103_v15 = vld [vmem:[%s4424_s7 + $0x60] sm:$0xff]  ;;  %v105_v17 = vld [vmem:[%s4424_s7 + $0x70] sm:$0xff]  ;;  %v106_v18 = vld [vmem:[%s4424_s7 + $0x78] sm:$0xff]  ;;  %122 = vst.msk [vmem:[#allocation2 + $0x70] sm:$0xff] %vm107_vm0, %v104_v16 }
  0x1b   :  { %121 = vst.msk [vmem:[#allocation2 + $0x68] sm:$0xff] %vm107_vm0, %v103_v15  ;;  %v99_v19 = vld [vmem:[%s4424_s7 + $0x40] sm:$0xff]  ;;  %123 = vst.msk [vmem:[#allocation2 + $0x78] sm:$0xff] %vm107_vm0, %v105_v17  ;;  %v100_v20 = vld [vmem:[%s4424_s7 + $0x48] sm:$0xff] }
  0x1c   :  { %124 = vst.msk [vmem:[#allocation2 + $0x80] sm:$0xff] %vm107_vm0, %v106_v18  ;;  %v101_v21 = vld [vmem:[%s4424_s7 + $0x50] sm:$0xff]  ;;  %v102_v22 = vld [vmem:[%s4424_s7 + $0x58] sm:$0xff]  ;;  %117 = vst.msk [vmem:[#allocation2 + $0x48] sm:$0xff] %vm107_vm0, %v99_v19 }
  0x1d   :  { %118 = vst.msk [vmem:[#allocation2 + $0x50] sm:$0xff] %vm107_vm0, %v100_v20  ;;  %119 = vst.msk [vmem:[#allocation2 + $0x58] sm:$0xff] %vm107_vm0, %v101_v21  ;;  %171 = vperm.xlu1 %3208, %v145_v14   ;;  %v3229_v28 = vld [vmem:[%s4425_s10] sm:$0xff]   ;;  %v146_v30 = vld [vmem:[%s4423_s9 + $0x28] sm:$0xff] }
  0x1e   :  { %120 = vst.msk [vmem:[#allocation2 + $0x60] sm:$0xff] %vm107_vm0, %v102_v22  ;;  %v198_v23 = vld [vmem:[#allocation2 + $0x8] ss:$2 sm:$0xff]  ;;  %v200_v24 = vld [vmem:[#allocation2 + $0x18] ss:$2 sm:$0xff]  ;;  %386 = vmatpush1.bf16.msra.mxu0 %v3229_v28 }
  0x1f   :  { %v3209_v25 = vpack.i.bf16 %v200_v24, %v198_v23  ;;  %v202_v26 = vld [vmem:[#allocation2 + $0x28] ss:$2 sm:$0xff]  ;;  %v148_v31 = vld [vmem:[%s4423_s9 + $0x38] sm:$0xff]  ;;  %387 = vmatprep.subr.bf16.mxu0 %v3349_v2  ;;  %v726_v43 = vld [vmem:[%s4426_s11] sm:$0xff] }
  0x20   :  { %v204_v27 = vld [vmem:[#allocation2 + $0x38] ss:$2 sm:$0xff]  ;;  %v3230_v32 = vld [vmem:[%s4425_s10 + $0x8] sm:$0xff]   ;;  %v147_v35 = vld [vmem:[%s4423_s9 + $0x30] sm:$0xff] }
  0x21   :  { %3210 = vrot.lane.b32.xlu0 %v3209_v25, %s3351_s0  ;;  %v3214_v29 = vpack.i.bf16 %v204_v27, %v202_v26  ;;  %v3231_v38 = vld [vmem:[%s4425_s10 + $0x10] sm:$0xff]   ;;  %v3232_v41 = vld [vmem:[%s4425_s10 + $0x18] sm:$0xff]   ;;  %v727_v42 = vld [vmem:[%s4426_s11 + $0x8] sm:$0xff] }
  0x22   :  { %v210_v33 = vld [vmem:[#allocation2 + $0x68] ss:$2 sm:$0xff]  ;;  %388 = vmatpush1.bf16.msra.mxu0 %v3230_v32  ;;  %v3233_v44 = vld [vmem:[%s4425_s10 + $0x20] sm:$0xff]   ;;  %v214_v45 = vld [vmem:[#allocation2 + $0x9] ss:$2 sm:$0xff] }
  0x23   :  { %3215 = vrot.lane.b32.xlu1 %v3214_v29, %s3351_s0  ;;  %v212_v34 = vld [vmem:[#allocation2 + $0x78] ss:$2 sm:$0xff]  ;;  %389 = vmatprep.subr.bf16.mxu0 %v3349_v2  ;;  %v216_v46 = vld [vmem:[#allocation2 + $0x19] ss:$2 sm:$0xff]  ;;  %v728_v49 = vld [vmem:[%s4426_s11 + $0x10] sm:$0xff] }
  0x24   :  { %v206_v36 = vld [vmem:[#allocation2 + $0x48] ss:$2 sm:$0xff]  ;;  %v3224_v39 = vpack.i.bf16 %v212_v34, %v210_v33  ;;  %v729_v47 = vld [vmem:[%s4426_s11 + $0x18] sm:$0xff]  ;;  %v270_v48 = vpack.c.bf16 %v216_v46, %v214_v45  ;;  %v1301_v52 = vld [vmem:[%s4427_s29] sm:$0xff] }
  0x25   :  { %176 = vperm.xlu0 %3207, %v146_v30   ;;  %v208_v37 = vld [vmem:[#allocation2 + $0x58] ss:$2 sm:$0xff]  ;;  %v3234_v50 = vld [vmem:[%s4425_s10 + $0x28] sm:$0xff]   ;;  %v3235_v53 = vld [vmem:[%s4425_s10 + $0x30] sm:$0xff]  }
  0x26   :  { %v3219_v40 = vpack.i.bf16 %v208_v37, %v206_v36  ;;  %390 = vmatpush1.bf16.msra.mxu0 %v3231_v38  ;;  %v1302_v51 = vld [vmem:[%s4427_s29 + $0x8] sm:$0xff]  ;;  %2661 = vmatprep.mubr.msk.bf16.mxu0 %vm107_vm0, %v270_v48  ;;  %v3236_v55 = vld [vmem:[%s4425_s10 + $0x38] sm:$0xff]   ;;  %v3237_v57 = vld [vmem:[%s4425_s10 + $0x40] sm:$0xff]  }
  0x27   :  { %186 = vperm.xlu1 %3208, %v148_v31   ;;  %391 = vmatprep.subr.bf16.mxu0 %v3349_v2  ;;  %v3238_v58 = vld [vmem:[%s4425_s10 + $0x48] sm:$0xff]   ;;  %v3239_v59 = vld [vmem:[%s4425_s10 + $0x50] sm:$0xff]   ;;  %v3240_v60 = vld [vmem:[%s4425_s10 + $0x58] sm:$0xff]  }
  0x29   :  { %181 = vperm.xlu0 %3207, %v147_v35  }
  0x2a   :  { %392 = vmatpush1.bf16.msra.mxu0 %v3232_v41 }
  0x2b   :  { %3225 = vrot.lane.b32.xlu1 %v3224_v39, %s3351_s0  ;;  %393 = vmatprep.subr.bf16.mxu0 %v3349_v2 }
  0x2d   :  { %3220 = vrot.lane.b32.xlu0 %v3219_v40, %s3351_s0 }
  0x2e   :  { %394 = vmatpush1.bf16.msra.mxu0 %v3233_v44 }
  0x2f   :  { %737 = vperm.xlu1 %3208, %v727_v42   ;;  %395 = vmatprep.subr.bf16.mxu0 %v3349_v2 }
  0x31   :  { %732 = vperm.xlu0 %3207, %v726_v43  }
  0x32   :  { %396 = vmatpush1.bf16.msra.mxu0 %v3234_v50 }
  0x33   :  { %747 = vperm.xlu1 %3208, %v729_v47   ;;  %397 = vmatprep.subr.bf16.mxu0 %v3349_v2 }
  0x35   :  { %742 = vperm.xlu0 %3207, %v728_v49  }
  0x36   :  { %398 = vmatpush1.bf16.msra.mxu0 %v3235_v53 }
  0x37   :  { %1310 = vperm.xlu1 %3208, %v1302_v51   ;;  %399 = vmatprep.subr.bf16.mxu0 %v3349_v2 }
  0x39   :  { %1305 = vperm.xlu0 %3207, %v1301_v52  }
  0x3a   :  { %400 = vmatpush1.bf16.msra.mxu0 %v3236_v55 }
  0x3b   :  { %401 = vmatprep.subr.bf16.mxu0 %v3349_v2 }
  0x3d   :  { %1818 = vperm.xlu0 %3207, %v1815_v54  }
  0x3e   :  { %402 = vmatpush1.bf16.msra.mxu0 %v3237_v57 }
  0x3f   :  { %403 = vmatprep.subr.bf16.mxu0 %v3349_v2 }
  0x41   :  { %2182 = vperm.xlu0 %3207, %v2179_v56  }
  0x42   :  { %404 = vmatpush1.bf16.msra.mxu0 %v3238_v58 }
  0x43   :  { %405 = vmatprep.subr.bf16.mxu0 %v3349_v2 }
  0x46   :  { %406 = vmatpush1.bf16.msra.mxu0 %v3239_v59 }
  0x47   :  { %407 = vmatprep.subr.bf16.mxu0 %v3349_v2 }
  0x4a   :  { %408 = vmatpush1.bf16.msra.mxu0 %v3240_v60 }
  0x4b   :  { %33 = vsyncpa [#allocation9], 0  ;;  %v126_v1 = vld [vmem:[#allocation2 + $0x7] ss:$2 sm:$0xff]  ;;  %v128_v3 = vld [vmem:[#allocation2 + $0x17] ss:$2 sm:$0xff] }
  0x4c   :  { %v218_v6 = vld [vmem:[#allocation2 + $0x29] ss:$2 sm:$0xff]  ;;  %v220_v7 = vld [vmem:[#allocation2 + $0x39] ss:$2 sm:$0xff]  ;;  %s4428_s4 = sld [smem:[#allocation14_spill]]  ;;  %v3352_v59 = vmov 0.0|0.0  }
  0x4d   :  { %v272_v15 = vpack.c.bf16 %v220_v7, %v218_v6  ;;  %v130_v16 = vld [vmem:[#allocation2 + $0x27] ss:$2 sm:$0xff]  ;;  %v132_v17 = vld [vmem:[#allocation2 + $0x37] ss:$2 sm:$0xff]  ;;  %3104 = vmatprep.subr.bf16.mxu1 %v3352_v59  ;;  %vm3353_vm1 = vmmov 0   ;;  %vm484_vm2 = vcmask 1040384  }
  0x4e   :  { %v222_v25 = vld [vmem:[#allocation2 + $0x49] ss:$2 sm:$0xff]  ;;  %v224_v26 = vld [vmem:[#allocation2 + $0x59] ss:$2 sm:$0xff]  ;;  %2929 = vmatprep.mubr.msk.f32.mxu1 %vm3353_vm1, %v3350_v9  ;;  %s4429_s5 = sld [smem:[#allocation15_spill]]  ;;  %vm595_vm3 = vcmask 1043456  }
  0x4f   :  { %v274_v30 = vpack.c.bf16 %v224_v26, %v222_v25  ;;  %v134_v33 = vld [vmem:[#allocation2 + $0x47] ss:$2 sm:$0xff]  ;;  %v136_v34 = vld [vmem:[#allocation2 + $0x57] ss:$2 sm:$0xff]  ;;  %s4430_s6 = sld [smem:[#allocation17_spill]]  ;;  %s4431_s10 = sld [smem:[#allocation16_spill]] }
  0x50   :  { %v226_v40 = vld [vmem:[#allocation2 + $0x69] ss:$2 sm:$0xff]  ;;  %v228_v41 = vld [vmem:[#allocation2 + $0x79] ss:$2 sm:$0xff]  ;;  %vm591_vm4 = vcmask 31744   ;;  %s4432_s12 = sld [smem:[#allocation19_spill]] }
  0x51   :  { %v276_v45 = vpack.c.bf16 %v228_v41, %v226_v40  ;;  %v140_v46 = vld [vmem:[#allocation2 + $0x77] ss:$2 sm:$0xff]  ;;  %v138_v47 = vld [vmem:[#allocation2 + $0x67] ss:$2 sm:$0xff]  ;;  %s4433_s1 = sld [smem:[#allocation20_spill]]  ;;  %vm1194_vm5 = vcmask 64512  }
  0x52   :  { %v486_v56 = vld [vmem:[%s4428_s4] sm:$0xff]  ;;  %v487_v57 = vld [vmem:[%s4428_s4 + $0x8] sm:$0xff]  ;;  %v488_v60 = vld [vmem:[%s4428_s4 + $0x10] sm:$0xff]  ;;  %vm2089_vm6 = vcmask 130048   ;;  %vm2336_vm7 = vcmask 257024   ;;  %vm2357_vm8 = vcmask 261120  }
  0x53   :  { %v3105_v58 = vpack.c.bf16 %v487_v57, %v486_v56  ;;  %v494_v6 = vld [vmem:[%s4428_s4 + $0x40] sm:$0xff]  ;;  %v495_v7 = vld [vmem:[%s4428_s4 + $0x48] sm:$0xff]  ;;  %vm2633_vm9 = vcmask 9216  }
  0x55   :  { %3106 = vmatpush3.bf16.msra.mxu1 %v3105_v58 }
  0x56   :  { %3107 = vmatprep.subr.bf16.mxu1 %v3352_v59 }
  0x94   :  { %v162_v61 = vpop.permute.xlu1 %161  ;;  %v152_v62 = vpop.permute.xlu0 %151 }
  0x95   :  { %v189_v8 = vmul.f32 %v152_v62, %v126_v1  ;;  %v191_v22 = vmul.f32 %v162_v61, %v130_v16  ;;  %v489_v61 = vld [vmem:[%s4428_s4 + $0x18] sm:$0xff]  ;;  %v500_v16 = vld [vmem:[%s4428_s4 + $0x70] sm:$0xff] }
  0x96   :  { %v3108_v62 = vpack.c.bf16 %v489_v61, %v488_v60 }
  0x98   :  { %v167_v63 = vpop.permute.xlu1 %166  ;;  %v157_v0 = vpop.permute.xlu0 %156  ;;  %3109 = vmatpush3.bf16.msra.mxu1 %v3108_v62 }
  0x99   :  { %v190_v10 = vmul.f32 %v157_v0, %v128_v3  ;;  %v192_v23 = vmul.f32 %v167_v63, %v132_v17  ;;  %3110 = vmatprep.subr.bf16.mxu1 %v3352_v59  ;;  %v490_v63 = vld [vmem:[%s4428_s4 + $0x20] sm:$0xff]  ;;  %v491_v0 = vld [vmem:[%s4428_s4 + $0x28] sm:$0xff]  ;;  %v492_v3 = vld [vmem:[%s4428_s4 + $0x30] sm:$0xff] }
  0x9a   :  { %v3111_v1 = vpack.c.bf16 %v491_v0, %v490_v63  ;;  %v501_v17 = vld [vmem:[%s4428_s4 + $0x78] sm:$0xff] }
  0x9c   :  { %v172_v4 = vpop.permute.xlu1 %171  ;;  %v3211_v5 = vpop.permute.xlu0 %3210  ;;  %3112 = vmatpush3.bf16.msra.mxu1 %v3111_v1 }
  0x9d   :  { %v3213_v11 = vunpack.i.h.bf16 %v3211_v5  ;;  %v3212_v12 = vunpack.i.l.bf16 %v3211_v5  ;;  %v193_v36 = vmul.f32 %v172_v4, %v134_v33  ;;  %3113 = vmatprep.subr.bf16.mxu1 %v3352_v59  ;;  %v493_v4 = vld [vmem:[%s4428_s4 + $0x38] sm:$0xff] }
  0x9e   :  { %v3114_v5 = vpack.c.bf16 %v493_v4, %v492_v3 }
  0x9f   :  { %v261_v13 = vsel %vm107_vm0, %v189_v8, %v3212_v12  ;;  %v262_v14 = vsel %vm107_vm0, %v190_v10, %v3213_v11  ;;  %v3117_v8 = vpack.c.bf16 %v495_v7, %v494_v6  ;;  %v496_v10 = vld [vmem:[%s4428_s4 + $0x50] sm:$0xff]  ;;  %v497_v11 = vld [vmem:[%s4428_s4 + $0x58] sm:$0xff] }
  0xa0   :  { %v3216_v18 = vpop.permute.xlu1 %3215  ;;  %v269_v19 = vpack.c.bf16 %v262_v14, %v261_v13  ;;  %3115 = vmatpush3.bf16.msra.mxu1 %v3114_v5  ;;  %v3120_v12 = vpack.c.bf16 %v497_v11, %v496_v10  ;;  %v498_v13 = vld [vmem:[%s4428_s4 + $0x60] sm:$0xff]  ;;  %v499_v14 = vld [vmem:[%s4428_s4 + $0x68] sm:$0xff]  ;;  %s4434_s4 = sld [smem:[#allocation22_spill]] }
  0xa1   :  { %v3218_v20 = vunpack.i.h.bf16 %v3216_v18  ;;  %v3217_v21 = vunpack.i.l.bf16 %v3216_v18  ;;  %3116 = vmatprep.subr.bf16.mxu1 %v3352_v59  ;;  %v3126_v18 = vpack.c.bf16 %v501_v17, %v500_v16  ;;  %v3241_v10 = vld [vmem:[%s4430_s6 + $0x80] sm:$0xff]  }
  0xa2   :  { %418 = vmatmul.mubr.bf16.vlgmr.msra.gmra.mrb[0].mxu0 %v269_v19  ;;  %v3242_v11 = vld [vmem:[%s4430_s6 + $0x40] sm:$0xff]   ;;  %2937 = vmatprep.subr.bf16.mxu0 %v3241_v10 }
  0xa3   :  { %2662 = vmatprep.mubr.msk.bf16.mxu0 %vm107_vm0, %v272_v15  ;;  %v263_v27 = vsel %vm107_vm0, %v191_v22, %v3217_v21  ;;  %v264_v28 = vsel %vm107_vm0, %v192_v23, %v3218_v20  ;;  %v3123_v15 = vpack.c.bf16 %v499_v14, %v498_v13  ;;  %2938 = vmatpush3.bf16.msra.mxu0 %v3241_v10 }
  0xa4   :  { %v177_v24 = vpop.permute.xlu0 %176  ;;  %v271_v32 = vpack.c.bf16 %v264_v28, %v263_v27  ;;  %3118 = vmatpush3.bf16.msra.mxu1 %v3117_v8  ;;  %v590_v8 = vld [vmem:[%s4429_s5] sm:$0xf] }
  0xa5   :  { %v194_v37 = vmul.f32 %v177_v24, %v136_v34  ;;  %3119 = vmatprep.subr.bf16.mxu1 %v3352_v59 }
  0xa6   :  { %v187_v31 = vpop.permute.xlu1 %186 }
  0xa7   :  { %v196_v51 = vmul.f32 %v187_v31, %v140_v46 }
  0xa8   :  { %v182_v29 = vpop.permute.xlu0 %181  ;;  %3121 = vmatpush3.bf16.msra.mxu1 %v3120_v12  ;;  %v3244_v12 = vld [vmem:[%s4430_s6 + $0x88] sm:$0xff]  }
  0xa9   :  { %v195_v52 = vmul.f32 %v182_v29, %v138_v47  ;;  %3122 = vmatprep.subr.bf16.mxu1 %v3352_v59  ;;  %2939 = vmatprep.subr.bf16.mxu0 %v3244_v12 }
  0xaa   :  { %426 = vmatmul.mubr.bf16.gmra.mrb[4].mxu0 %v271_v32  ;;  %v3226_v42 = vpop.permute.xlu1 %3225 }
  0xab   :  { %2663 = vmatprep.mubr.msk.bf16.mxu0 %vm107_vm0, %v274_v30  ;;  %v3228_v49 = vunpack.i.h.bf16 %v3226_v42  ;;  %v3227_v50 = vunpack.i.l.bf16 %v3226_v42  ;;  %2940 = vmatpush3.bf16.msra.mxu0 %v3244_v12 }
  0xac   :  { %v3221_v35 = vpop.permute.xlu0 %3220  ;;  %3124 = vmatpush3.bf16.msra.mxu1 %v3123_v15 }
  0xad   :  { %v3223_v38 = vunpack.i.h.bf16 %v3221_v35  ;;  %v3222_v39 = vunpack.i.l.bf16 %v3221_v35  ;;  %v267_v53 = vsel %vm107_vm0, %v195_v52, %v3227_v50  ;;  %v268_v54 = vsel %vm107_vm0, %v196_v51, %v3228_v49  ;;  %3125 = vmatprep.subr.bf16.mxu1 %v3352_v59 }
  0xae   :  { %v275_v55 = vpack.c.bf16 %v268_v54, %v267_v53 }
  0xaf   :  { %v265_v43 = vsel %vm107_vm0, %v193_v36, %v3222_v39  ;;  %v266_v44 = vsel %vm107_vm0, %v194_v37, %v3223_v38 }
  0xb0   :  { %v273_v48 = vpack.c.bf16 %v266_v44, %v265_v43  ;;  %3127 = vmatpush3.bf16.msra.mxu1 %v3126_v18 }
  0xb1   :  { %2932 = vmatprep.subr.mxu1 %v3350_v9 }
  0xb2   :  { %434 = vmatmul.mubr.bf16.gmra.mrb[8].mxu0 %v273_v48 }
  0xb3   :  { %2664 = vmatprep.mubr.msk.bf16.mxu0 %vm107_vm0, %v276_v45 }
  0xba   :  { %442 = vmatmul.mubr.bf16.gmra.mrb[12].mxu0 %v275_v55 }
 0x175   :  { %v3746_v19 = vpop.f32.mrb[0].mxu0 }
 0x176   :  { %v421_v20 = vpop.f32.mrb[1].mxu0  ;;  %v463_v22 = vmul.f32 %v3746_v19, %v3746_v19 }
 0x177   :  { %v3748_v21 = vpop.f32.mrb[2].mxu0 }
 0x178   :  { %v450_v23 = vadd.f32 %v3748_v21, %v3746_v19  ;;  %v464_v24 = vmul.f32 %v3748_v21, %v3748_v21  ;;  %v424_v25 = vpop.f32.mrb[3].mxu0 }
 0x17a   :  { %v471_v26 = vadd.f32 %v464_v24, %v463_v22  ;;  %v577_v22 = vld [vmem:[%s4431_s10] sm:$0x3] }
 0x17d   :  { %v3756_v27 = vpop.f32.mrb[4].mxu0 }
 0x17e   :  { %v451_v28 = vadd.f32 %v450_v23, %v3756_v27  ;;  %v465_v29 = vmul.f32 %v3756_v27, %v3756_v27  ;;  %v429_v30 = vpop.f32.mrb[5].mxu0 }
 0x17f   :  { %v3761_v31 = vpop.f32.mrb[6].mxu0  ;;  %v3245_v30 = vld [vmem:[%s4430_s6 + $0x48] sm:$0xff]  }
 0x180   :  { %v472_v32 = vadd.f32 %v471_v26, %v465_v29  ;;  %v452_v33 = vadd.f32 %v451_v28, %v3761_v31  ;;  %v466_v34 = vmul.f32 %v3761_v31, %v3761_v31  ;;  %v432_v35 = vpop.f32.mrb[7].mxu0  ;;  %v3243_v29 = vld [vmem:[%s4430_s6] sm:$0xff]  }
 0x181   :  { %v3249_v35 = vld [vmem:[%s4430_s6 + $0x10] sm:$0xff]  }
 0x182   :  { %v473_v36 = vadd.f32 %v472_v32, %v466_v34  ;;  %v3248_v34 = vld [vmem:[%s4430_s6 + $0x50] sm:$0xff]  }
 0x185   :  { %v3766_v37 = vpop.f32.mrb[8].mxu0 }
 0x186   :  { %v453_v38 = vadd.f32 %v452_v33, %v3766_v37  ;;  %v467_v39 = vmul.f32 %v3766_v37, %v3766_v37  ;;  %v437_v40 = vpop.f32.mrb[9].mxu0  ;;  %v3246_v33 = vld [vmem:[%s4430_s6 + $0x8] sm:$0xff]  }
 0x187   :  { %v3771_v41 = vpop.f32.mrb[10].mxu0  ;;  %v3253_v40 = vld [vmem:[%s4430_s6 + $0xa0] sm:$0xff]  }
 0x188   :  { %v474_v42 = vadd.f32 %v473_v36, %v467_v39  ;;  %v454_v43 = vadd.f32 %v453_v38, %v3771_v41  ;;  %v468_v44 = vmul.f32 %v3771_v41, %v3771_v41  ;;  %v440_v45 = vpop.f32.mrb[11].mxu0  ;;  %v3250_v36 = vld [vmem:[%s4430_s6 + $0x98] sm:$0xff]  }
 0x189   :  { %v3251_v38 = vld [vmem:[%s4430_s6 + $0x58] sm:$0xff]   ;;  %v3257_v45 = vld [vmem:[%s4430_s6 + $0x68] sm:$0xff]  }
 0x18a   :  { %v475_v46 = vadd.f32 %v474_v42, %v468_v44  ;;  %v3252_v39 = vld [vmem:[%s4430_s6 + $0x18] sm:$0xff]   ;;  %v3254_v42 = vld [vmem:[%s4430_s6 + $0x60] sm:$0xff]   ;;  %v3256_v44 = vld [vmem:[%s4430_s6 + $0xa8] sm:$0xff]  }
 0x18d   :  { %v3776_v47 = vpop.f32.mrb[12].mxu0 }
 0x18e   :  { %v455_v48 = vadd.f32 %v454_v43, %v3776_v47  ;;  %v469_v49 = vmul.f32 %v3776_v47, %v3776_v47  ;;  %v445_v50 = vpop.f32.mrb[13].mxu0  ;;  %v3255_v43 = vld [vmem:[%s4430_s6 + $0x20] sm:$0xff]  }
 0x18f   :  { %v3781_v51 = vpop.f32.mrb[14].mxu0  ;;  %v3261_v50 = vld [vmem:[%s4430_s6 + $0x30] sm:$0xff]  }
 0x190   :  { %v476_v52 = vadd.f32 %v475_v46, %v469_v49  ;;  %v456_v53 = vadd.f32 %v455_v48, %v3781_v51  ;;  %v470_v54 = vmul.f32 %v3781_v51, %v3781_v51  ;;  %v448_v55 = vpop.f32.mrb[15].mxu0  ;;  %v3258_v46 = vld [vmem:[%s4430_s6 + $0x28] sm:$0xff]   ;;  %v3259_v48 = vld [vmem:[%s4430_s6 + $0xb0] sm:$0xff]  }
 0x191   :  { %v3260_v49 = vld [vmem:[%s4430_s6 + $0x70] sm:$0xff]   ;;  %v3868_v55 = vld [vmem:[#allocation3] sm:$0xff] }
 0x192   :  { %v457_v56 = vrot.slane %v456_v53, 4  ;;  %v477_v57 = vadd.f32 %v476_v52, %v470_v54  ;;  %v3262_v52 = vld [vmem:[%s4430_s6 + $0xb8] sm:$0xff]  }
 0x193   :  { %v3264_v54 = vld [vmem:[%s4430_s6 + $0x38] sm:$0xff]  }
 0x194   :  { %v458_v58 = vadd.f32 %v457_v56, %v456_v53  ;;  %v478_v60 = vrot.slane %v477_v57, 4  ;;  %v3263_v53 = vld [vmem:[%s4430_s6 + $0x78] sm:$0xff]   ;;  %v669_v56 = vlaneseq }
 0x196   :  { %v459_v61 = vrot.slane %v458_v58, 2  ;;  %v479_v62 = vadd.f32 %v478_v60, %v477_v57  ;;  %v670_v57 = vshrl.u32 %v669_v56, 7 }
 0x198   :  { %v460_v63 = vadd.f32 %v459_v61, %v458_v58  ;;  %v480_v0 = vrot.slane %v479_v62, 2  ;;  %v3872_v58 = vsub.s32 0, %v670_v57  ;;  %v3874_v60 = vsub.s32 1, %v670_v57 }
 0x19a   :  { %v461_v1 = vrot.slane %v460_v63, 1  ;;  %v481_v3 = vadd.f32 %v480_v0, %v479_v62 }
 0x19c   :  { %v482_v4 = vrot.slane %v481_v3, 1  ;;  %v462_v5 = vadd.f32 %v461_v1, %v460_v63 }
 0x19e   :  { %v483_v6 = vadd.f32 %v482_v4, %v481_v3 }
 0x1a0   :  { %v485_v7 = vsel %vm484_vm2, %v462_v5, %v483_v6 }
 0x1a1   :  { %2930 = vmatmul.mubr.f32.vlgmr.msra.gmra.mrb[0].mxu1 %v485_v7 }
 0x1a2   :  { %2934 = vmatprep.mubr.msk.f32.mxu1 %vm3353_vm1, %v3350_v9  ;;  %2933 = vmatpush3.msk.msra.mxu1 %vm595_vm3, %v590_v8  ;;  %v3247_v9 = vld [vmem:[%s4430_s6 + $0x90] sm:$0xff]   ;;  %s4435_s6 = sld [smem:[#allocation21_spill]] }
 0x1a3   :  { %2769 = vmatprep.subr.bf16.mxu1 %v3242_v11  ;;  %2941 = vmatprep.subr.bf16.mxu0 %v3247_v9 }
 0x1a4   :  { %2942 = vmatpush3.bf16.msra.mxu0 %v3247_v9 }
 0x1a5   :  { %2943 = vmatprep.subr.bf16.mxu0 %v3250_v36 }
 0x1a8   :  { %2944 = vmatpush3.bf16.msra.mxu0 %v3250_v36 }
 0x1a9   :  { %2945 = vmatprep.subr.bf16.mxu0 %v3253_v40 }
 0x1ac   :  { %2946 = vmatpush3.bf16.msra.mxu0 %v3253_v40 }
 0x1ad   :  { %2947 = vmatprep.subr.bf16.mxu0 %v3256_v44 }
 0x1b0   :  { %2948 = vmatpush3.bf16.msra.mxu0 %v3256_v44 }
 0x1b1   :  { %2949 = vmatprep.subr.bf16.mxu0 %v3259_v48 }
 0x1b4   :  { %2950 = vmatpush3.bf16.msra.mxu0 %v3259_v48 }
 0x1b5   :  { %2951 = vmatprep.subr.bf16.mxu0 %v3262_v52 }
 0x1b8   :  { %2952 = vmatpush3.bf16.msra.mxu0 %v3262_v52 }
 0x1b9   :  { %2992 = vmatprep.subr.mxu0 %v3868_v55 }
 0x274   :  { %v568_v13 = vpop.f32.mrb[0].mxu1 }
 0x275   :  { %v572_v14 = vmul.f32 %v568_v13, %v568_v13  ;;  %v2931_v15 = vpop.f32.mrb[1].mxu1 }
 0x277   :  { %v574_v16 = vrot.slane %v572_v14, 7 }
 0x279   :  { %v576_v17 = vsub.f32 %v568_v13, %v574_v16 }
 0x27b   :  { %v578_v18 = vadd.f32 1e-05, %v576_v17 }
 0x27d   :  { %3313 = vrsqrt.f32 %v578_v18 }
 0x287   :  { %v3314_v20 = vpop.eup %3313 }
 0x288   :  { %v581_v23 = vrot.slane %v3314_v20, 1 }
 0x28a   :  { %v583_v24 = vmul.f32 %v581_v23, %v577_v22 }
 0x28c   :  { %v584_v25 = vmul.f32 %v583_v24, %v568_v13 }
 0x28e   :  { %v586_v26 = vrot.slane %v584_v25, 7 }
 0x290   :  { %v588_v28 = vsub.f32 %v577_v22, %v586_v26 }
 0x292   :  { %v589_v32 = vsel %vm484_vm2, %v583_v24, %v588_v28 }
 0x293   :  { %2935 = vmatmul.mubr.msk.f32.vlgmr.msra.gmra.mrb[2].mxu1 %vm591_vm4, %v589_v32 }
 0x294   :  { %2770 = vmatpush3.bf16.msra.mxu1 %v3243_v29  ;;  %v733_v29 = vpop.permute.xlu0 %732 }
 0x295   :  { %2771 = vmatprep.subr.bf16.mxu1 %v3245_v30 }
 0x298   :  { %2772 = vmatpush3.bf16.msra.mxu1 %v3246_v33  ;;  %v743_v57 = vpop.permute.xlu0 %742 }
 0x299   :  { %2773 = vmatprep.subr.bf16.mxu1 %v3248_v34 }
 0x29c   :  { %2774 = vmatpush3.bf16.msra.mxu1 %v3249_v35 }
 0x29d   :  { %2775 = vmatprep.subr.bf16.mxu1 %v3251_v38 }
 0x2a0   :  { %2776 = vmatpush3.bf16.msra.mxu1 %v3252_v39  ;;  %v738_v39 = vpop.permute.xlu1 %737 }
 0x2a1   :  { %2777 = vmatprep.subr.bf16.mxu1 %v3254_v42 }
 0x2a4   :  { %2778 = vmatpush3.bf16.msra.mxu1 %v3255_v43  ;;  %v748_v56 = vpop.permute.xlu1 %747 }
 0x2a5   :  { %2779 = vmatprep.subr.bf16.mxu1 %v3257_v45 }
 0x2a8   :  { %2780 = vmatpush3.bf16.msra.mxu1 %v3258_v46 }
 0x2a9   :  { %2781 = vmatprep.subr.bf16.mxu1 %v3260_v49 }
 0x2ac   :  { %2782 = vmatpush3.bf16.msra.mxu1 %v3261_v50 }
 0x2ad   :  { %2783 = vmatprep.subr.bf16.mxu1 %v3263_v53 }
 0x2b0   :  { %2784 = vmatpush3.bf16.msra.mxu1 %v3264_v54 }
 0x2b1   :  { %3128 = vmatprep.subr.bf16.mxu1 %v3352_v59 }
 0x366   :  { %v665_v61 = vpop.f32.mrb[2].mxu1 }
 0x367   :  { %v672_v62 = vrot.slane %v665_v61, %v3872_v58  ;;  %v2936_v63 = vpop.f32.mrb[3].mxu1  ;;  %v684_v0 = vrot.slane %v665_v61, %v3874_v60 }
 0x369   :  { %v673_v1 = vmul.f32 %v672_v62, %v3746_v19  ;;  %v674_v3 = vmul.f32 %v672_v62, %v3748_v21  ;;  %v675_v4 = vmul.f32 %v672_v62, %v3756_v27  ;;  %v676_v5 = vmul.f32 %v672_v62, %v3761_v31 }
 0x36a   :  { %v677_v6 = vmul.f32 %v672_v62, %v3766_v37  ;;  %v678_v7 = vmul.f32 %v672_v62, %v3771_v41  ;;  %v679_v8 = vmul.f32 %v672_v62, %v3776_v47  ;;  %v680_v10 = vmul.f32 %v672_v62, %v3781_v51 }
 0x36b   :  { %v685_v11 = vadd.f32 %v684_v0, %v673_v1  ;;  %v686_v12 = vadd.f32 %v684_v0, %v674_v3  ;;  %v687_v9 = vadd.f32 %v684_v0, %v675_v4  ;;  %v688_v13 = vadd.f32 %v684_v0, %v676_v5  ;;  %v1090_v1 = vld [vmem:[%s4432_s12 + $0x8] sm:$0xff]  ;;  %v1091_v4 = vld [vmem:[%s4432_s12 + $0x10] sm:$0xff]  ;;  %v1092_v5 = vld [vmem:[%s4432_s12 + $0x18] sm:$0xff] }
 0x36c   :  { %v689_v14 = vadd.f32 %v684_v0, %v677_v6  ;;  %v690_v19 = vadd.f32 %v684_v0, %v678_v7  ;;  %v691_v15 = vadd.f32 %v684_v0, %v679_v8  ;;  %v692_v21 = vadd.f32 %v684_v0, %v680_v10  ;;  %v1089_v0 = vld [vmem:[%s4432_s12] sm:$0xff]  ;;  %v1094_v8 = vld [vmem:[%s4432_s12 + $0x28] sm:$0xff] }
 0x36d   :  { %v693_v16 = vmul.f32 0.01, %v685_v11  ;;  %v694_v27 = vmul.f32 0.01, %v686_v12  ;;  %v695_v17 = vmul.f32 0.01, %v687_v9  ;;  %v3129_v3 = vpack.c.bf16 %v1090_v1, %v1089_v0 }
 0x36e   :  { %v696_v31 = vmul.f32 0.01, %v688_v13  ;;  %v697_v18 = vmul.f32 0.01, %v689_v14  ;;  %v698_v37 = vmul.f32 0.01, %v690_v19  ;;  %v3132_v6 = vpack.c.bf16 %v1092_v5, %v1091_v4 }
 0x36f   :  { %v699_v20 = vmul.f32 0.01, %v691_v15  ;;  %v700_v41 = vmul.f32 0.01, %v692_v21  ;;  %v701_v22 = vmax.f32 %v685_v11, %v693_v16  ;;  %v702_v47 = vmax.f32 %v686_v12, %v694_v27  ;;  %v1093_v7 = vld [vmem:[%s4432_s12 + $0x20] sm:$0xff]  ;;  %v1095_v11 = vld [vmem:[%s4432_s12 + $0x30] sm:$0xff] }
 0x370   :  { %v703_v23 = vmax.f32 %v687_v9, %v695_v17  ;;  %v704_v51 = vmax.f32 %v688_v13, %v696_v31  ;;  %v705_v24 = vmax.f32 %v689_v14, %v697_v18  ;;  %v706_v25 = vmax.f32 %v690_v19, %v698_v37  ;;  %v1096_v12 = vld [vmem:[%s4432_s12 + $0x38] sm:$0xff]  ;;  %v1097_v13 = vld [vmem:[%s4432_s12 + $0x40] sm:$0xff]  ;;  %v1098_v14 = vld [vmem:[%s4432_s12 + $0x48] sm:$0xff] }
 0x371   :  { %v707_v26 = vmax.f32 %v691_v15, %v699_v20  ;;  %v708_v28 = vmax.f32 %v692_v21, %v700_v41  ;;  %710 = vst [vmem:[#allocation3 + $0x8] sm:$0xff] %v701_v22  ;;  %711 = vst [vmem:[#allocation3 + $0x10] sm:$0xff] %v702_v47  ;;  %v3135_v10 = vpack.c.bf16 %v1094_v8, %v1093_v7  ;;  %v1099_v15 = vld [vmem:[%s4432_s12 + $0x50] sm:$0xff]  ;;  %v1100_v21 = vld [vmem:[%s4432_s12 + $0x58] sm:$0xff] }
 0x372   :  { %712 = vst [vmem:[#allocation3 + $0x18] sm:$0xff] %v703_v23  ;;  %713 = vst [vmem:[#allocation3 + $0x20] sm:$0xff] %v704_v51  ;;  %v3138_v9 = vpack.c.bf16 %v1096_v12, %v1095_v11  ;;  %v3141_v19 = vpack.c.bf16 %v1098_v14, %v1097_v13  ;;  %v3144_v16 = vpack.c.bf16 %v1100_v21, %v1099_v15  ;;  %v1101_v27 = vld [vmem:[%s4432_s12 + $0x60] sm:$0xff]  ;;  %v1102_v17 = vld [vmem:[%s4432_s12 + $0x68] sm:$0xff] }
 0x373   :  { %714 = vst [vmem:[#allocation3 + $0x28] sm:$0xff] %v705_v24  ;;  %715 = vst [vmem:[#allocation3 + $0x30] sm:$0xff] %v706_v25  ;;  %v1103_v31 = vld [vmem:[%s4432_s12 + $0x70] sm:$0xff]  ;;  %v3147_v18 = vpack.c.bf16 %v1102_v17, %v1101_v27  ;;  %v1104_v37 = vld [vmem:[%s4432_s12 + $0x78] sm:$0xff] }
 0x374   :  { %716 = vst [vmem:[#allocation3 + $0x38] sm:$0xff] %v707_v26  ;;  %717 = vst [vmem:[#allocation3 + $0x40] sm:$0xff] %v708_v28  ;;  %v3150_v20 = vpack.c.bf16 %v1104_v37, %v1103_v31  ;;  %v3265_v11 = vld [vmem:[%s4434_s4 + $0x80] sm:$0xff]   ;;  %v3271_v13 = vld [vmem:[%s4434_s4 + $0x90] sm:$0xff]  }
 0x375   :  { %v3266_v12 = vld [vmem:[%s4434_s4 + $0x40] sm:$0xff]  }
 0x376   :  { %v1180_v31 = vld [vmem:[%s4435_s6] sm:$0x3] }
 0x378   :  { %v755_v30 = vld [vmem:[#allocation3 + $0x8] ss:$2 sm:$0xff]  ;;  %v763_v32 = vld [vmem:[#allocation3 + $0x9] ss:$2 sm:$0xff] }
 0x379   :  { %v719_v33 = vld [vmem:[#allocation3 + $0x7] ss:$2 sm:$0xff]  ;;  %v757_v34 = vld [vmem:[#allocation3 + $0x18] ss:$2 sm:$0xff]  ;;  %v721_v44 = vld [vmem:[#allocation3 + $0x17] ss:$2 sm:$0xff] }
 0x37a   :  { %v765_v35 = vld [vmem:[#allocation3 + $0x19] ss:$2 sm:$0xff]  ;;  %v767_v36 = vld [vmem:[#allocation3 + $0x29] ss:$2 sm:$0xff]  ;;  %v750_v38 = vmul.f32 %v733_v29, %v719_v33  ;;  %v771_v40 = vpack.c.bf16 %v757_v34, %v755_v30  ;;  %v751_v46 = vmul.f32 %v738_v39, %v721_v44  ;;  %v759_v48 = vld [vmem:[#allocation3 + $0x28] ss:$2 sm:$0xff] }
 0x37b   :  { %v772_v42 = vpack.c.bf16 %v765_v35, %v763_v32  ;;  %v769_v43 = vld [vmem:[#allocation3 + $0x39] ss:$2 sm:$0xff]  ;;  %v761_v49 = vld [vmem:[#allocation3 + $0x38] ss:$2 sm:$0xff] }
 0x37c   :  { %v775_v45 = vpack.c.bf16 %v769_v43, %v767_v36  ;;  %1000 = vmatprep.mubr.bf16.mxu1 %v771_v40  ;;  %v770_v50 = vpack.c.bf16 %v751_v46, %v750_v38  ;;  %v774_v52 = vpack.c.bf16 %v761_v49, %v759_v48  ;;  %v723_v53 = vld [vmem:[#allocation3 + $0x27] ss:$2 sm:$0xff]  ;;  %v725_v54 = vld [vmem:[#allocation3 + $0x37] ss:$2 sm:$0xff] }
 0x37d   :  { %2953 = vmatprep.mubr.bf16.mxu0 %v772_v42  ;;  %v752_v61 = vmul.f32 %v743_v57, %v723_v53  ;;  %v753_v62 = vmul.f32 %v748_v56, %v725_v54 }
 0x37e   :  { %2954 = vmatmul.mubr.bf16.vlgmr.msra.gmra.mrb[16].mxu0 %v775_v45  ;;  %1001 = vmatmul.mubr.bf16.vlgmr.msra.gmra.mrb[4].mxu1 %v770_v50 }
 0x37f   :  { %2994 = vmatprep.mubr.msk.f32.mxu0 %vm3353_vm1, %v3868_v55  ;;  %1008 = vmatprep.mubr.bf16.mxu1 %v774_v52  ;;  %v773_v63 = vpack.c.bf16 %v753_v62, %v752_v61 }
 0x380   :  { %3130 = vmatpush3.bf16.msra.mxu1 %v3129_v3 }
 0x381   :  { %3131 = vmatprep.subr.bf16.mxu1 %v3352_v59 }
 0x384   :  { %3133 = vmatpush3.bf16.msra.mxu1 %v3132_v6 }
 0x385   :  { %3134 = vmatprep.subr.bf16.mxu1 %v3352_v59 }
 0x386   :  { %1009 = vmatmul.mubr.bf16.gmra.mrb[8].mxu1 %v773_v63 }
 0x387   :  { %2989 = vmatprep.mubr.msk.f32.mxu1 %vm3353_vm1, %v3868_v55 }
 0x388   :  { %3136 = vmatpush3.bf16.msra.mxu1 %v3135_v10  ;;  %v1193_v10 = vld [vmem:[%s4433_s1] sm:$0xff] }
 0x389   :  { %3137 = vmatprep.subr.bf16.mxu1 %v3352_v59  ;;  %2993 = vmatpush3.msra.mxu0 %v1193_v10 }
 0x38a   :  { %2826 = vmatprep.subr.bf16.mxu0 %v3266_v12 }
 0x38c   :  { %3139 = vmatpush3.bf16.msra.mxu1 %v3138_v9  ;;  %v3268_v9 = vld [vmem:[%s4434_s4 + $0x88] sm:$0xff]  }
 0x38d   :  { %3140 = vmatprep.subr.bf16.mxu1 %v3352_v59 }
 0x390   :  { %3142 = vmatpush3.bf16.msra.mxu1 %v3141_v19 }
 0x391   :  { %3143 = vmatprep.subr.bf16.mxu1 %v3352_v59 }
 0x394   :  { %3145 = vmatpush3.bf16.msra.mxu1 %v3144_v16 }
 0x395   :  { %3146 = vmatprep.subr.bf16.mxu1 %v3352_v59 }
 0x398   :  { %3148 = vmatpush3.bf16.msra.mxu1 %v3147_v18 }
 0x399   :  { %3149 = vmatprep.subr.bf16.mxu1 %v3352_v59 }
 0x39c   :  { %3151 = vmatpush3.bf16.msra.mxu1 %v3150_v20 }
 0x39d   :  { %2997 = vmatprep.subr.bf16.mxu1 %v3868_v55 }
 0x451   :  { %v2955_v41 = vpop.f32.mrb[16].mxu0  ;;  %v2785_v47 = vpop.f32.mrb[4].mxu1 }
 0x452   :  { %v1051_v22 = vpop.f32.mrb[17].mxu0  ;;  %v2786_v51 = vpop.f32.mrb[5].mxu1 }
 0x453   :  { %v2956_v23 = vpop.f32.mrb[18].mxu0  ;;  %v2787_v25 = vadd.f32 %v2786_v51, %v2785_v47  ;;  %v2788_v26 = vpop.f32.mrb[6].mxu1  ;;  %v3267_v47 = vld [vmem:[%s4434_s4] sm:$0xff]  }
 0x454   :  { %v1054_v24 = vpop.f32.mrb[19].mxu0  ;;  %v2789_v28 = vpop.f32.mrb[7].mxu1 }
 0x455   :  { %v3946_v29 = vadd.f32 %v2787_v25, %v1051_v22  ;;  %v2790_v30 = vadd.f32 %v2789_v28, %v2788_v26  ;;  %v3272_v25 = vld [vmem:[%s4434_s4 + $0x50] sm:$0xff]   ;;  %v3274_v28 = vld [vmem:[%s4434_s4 + $0x98] sm:$0xff]  }
 0x456   :  { %v3273_v26 = vld [vmem:[%s4434_s4 + $0x10] sm:$0xff]  }
 0x457   :  { %v3948_v32 = vadd.f32 %v2790_v30, %v1054_v24  ;;  %v1075_v40 = vmul.f32 %v3946_v29, %v3946_v29  ;;  %v3270_v24 = vld [vmem:[%s4434_s4 + $0x8] sm:$0xff]   ;;  %v3275_v30 = vld [vmem:[%s4434_s4 + $0x58] sm:$0xff]  }
 0x459   :  { %v2791_v33 = vpop.f32.mrb[8].mxu1  ;;  %v1076_v35 = vmul.f32 %v3948_v32, %v3948_v32  ;;  %v1066_v42 = vadd.f32 %v3948_v32, %v3946_v29 }
 0x45a   :  { %v2792_v34 = vpop.f32.mrb[9].mxu1 }
 0x45b   :  { %v2793_v36 = vadd.f32 %v2792_v34, %v2791_v33  ;;  %v2794_v38 = vpop.f32.mrb[10].mxu1  ;;  %v1079_v45 = vadd.f32 %v1076_v35, %v1075_v40  ;;  %v3276_v33 = vld [vmem:[%s4434_s4 + $0x18] sm:$0xff]   ;;  %v3277_v34 = vld [vmem:[%s4434_s4 + $0xa0] sm:$0xff]   ;;  %v3282_v40 = vld [vmem:[%s4434_s4 + $0x28] sm:$0xff]  }
 0x45c   :  { %v2795_v39 = vpop.f32.mrb[11].mxu1  ;;  %v3278_v35 = vld [vmem:[%s4434_s4 + $0x60] sm:$0xff]  }
 0x45d   :  { %v3956_v43 = vadd.f32 %v2955_v41, %v2793_v36  ;;  %v2796_v44 = vadd.f32 %v2795_v39, %v2794_v38  ;;  %v3279_v36 = vld [vmem:[%s4434_s4 + $0x20] sm:$0xff]   ;;  %v3280_v38 = vld [vmem:[%s4434_s4 + $0xa8] sm:$0xff]  }
 0x45e   :  { %v3281_v39 = vld [vmem:[%s4434_s4 + $0x68] sm:$0xff]  }
 0x45f   :  { %v1067_v46 = vadd.f32 %v1066_v42, %v3956_v43  ;;  %v1077_v48 = vmul.f32 %v3956_v43, %v3956_v43  ;;  %v3961_v49 = vadd.f32 %v2956_v23, %v2796_v44  ;;  %v3269_v23 = vld [vmem:[%s4434_s4 + $0x48] sm:$0xff]   ;;  %v3283_v42 = vld [vmem:[%s4434_s4 + $0xb0] sm:$0xff]  }
 0x460   :  { %v3284_v44 = vld [vmem:[%s4434_s4 + $0x70] sm:$0xff]  }
 0x461   :  { %v1080_v50 = vadd.f32 %v1079_v45, %v1077_v48  ;;  %v1068_v52 = vadd.f32 %v1067_v46, %v3961_v49  ;;  %v1078_v53 = vmul.f32 %v3961_v49, %v3961_v49  ;;  %v3285_v45 = vld [vmem:[%s4434_s4 + $0x30] sm:$0xff]   ;;  %v3287_v46 = vld [vmem:[%s4434_s4 + $0x78] sm:$0xff]  }
 0x462   :  { %v3286_v48 = vld [vmem:[%s4434_s4 + $0xb8] sm:$0xff]  }
 0x463   :  { %v1069_v54 = vrot.slane %v1068_v52, 4  ;;  %v1081_v56 = vadd.f32 %v1080_v50, %v1078_v53  ;;  %v3288_v50 = vld [vmem:[%s4434_s4 + $0x38] sm:$0xff]  }
 0x465   :  { %v1070_v57 = vadd.f32 %v1069_v54, %v1068_v52  ;;  %v1082_v61 = vrot.slane %v1081_v56, 4 }
 0x467   :  { %v1071_v62 = vrot.slane %v1070_v57, 2  ;;  %v1083_v63 = vadd.f32 %v1082_v61, %v1081_v56 }
 0x469   :  { %v1072_v0 = vadd.f32 %v1071_v62, %v1070_v57  ;;  %v1084_v1 = vrot.slane %v1083_v63, 2 }
 0x46b   :  { %v1073_v3 = vrot.slane %v1072_v0, 1  ;;  %v1085_v4 = vadd.f32 %v1084_v1, %v1083_v63 }
 0x46d   :  { %v1086_v5 = vrot.slane %v1085_v4, 1  ;;  %v1074_v6 = vadd.f32 %v1073_v3, %v1072_v0 }
 0x46f   :  { %v1087_v7 = vadd.f32 %v1086_v5, %v1085_v4 }
 0x471   :  { %v1088_v8 = vsel %vm484_vm2, %v1074_v6, %v1087_v7 }
 0x472   :  { %2990 = vmatmul.mubr.f32.vlgmr.msra.gmra.mrb[12].mxu1 %v1088_v8 }
 0x473   :  { %3013 = vmatprep.mubr.msk.bf16.mxu1 %vm3353_vm1, %v3868_v55  ;;  %2998 = vmatpush3.bf16.msra.mxu1 %v3265_v11 }
 0x474   :  { %2999 = vmatprep.subr.bf16.mxu1 %v3868_v55 }
 0x477   :  { %3000 = vmatpush3.bf16.msra.mxu1 %v3268_v9 }
 0x478   :  { %3001 = vmatprep.subr.bf16.mxu1 %v3868_v55 }
 0x47b   :  { %3002 = vmatpush3.bf16.msra.mxu1 %v3271_v13  ;;  %v1311_v13 = vpop.permute.xlu1 %1310 }
 0x47c   :  { %3003 = vmatprep.subr.bf16.mxu1 %v3868_v55 }
 0x47f   :  { %3004 = vmatpush3.bf16.msra.mxu1 %v3274_v28 }
 0x480   :  { %3005 = vmatprep.subr.bf16.mxu1 %v3868_v55 }
 0x483   :  { %3006 = vmatpush3.bf16.msra.mxu1 %v3277_v34 }
 0x484   :  { %3007 = vmatprep.subr.bf16.mxu1 %v3868_v55 }
 0x487   :  { %3008 = vmatpush3.bf16.msra.mxu1 %v3280_v38 }
 0x488   :  { %3009 = vmatprep.subr.bf16.mxu1 %v3868_v55 }
 0x48b   :  { %3010 = vmatpush3.bf16.msra.mxu1 %v3283_v42 }
 0x48c   :  { %3011 = vmatprep.subr.bf16.mxu1 %v3868_v55 }
 0x48f   :  { %3012 = vmatpush3.bf16.msra.mxu1 %v3286_v48 }
 0x490   :  { %1932 = vmatprep.subr.bf16.mxu1 %v3349_v2 }
 0x545   :  { %v1171_v14 = vpop.f32.mrb[12].mxu1 }
 0x546   :  { %v1175_v19 = vmul.f32 %v1171_v14, %v1171_v14  ;;  %v2991_v15 = vpop.f32.mrb[13].mxu1 }
 0x548   :  { %v1177_v21 = vrot.slane %v1175_v19, 7 }
 0x54a   :  { %v1179_v16 = vsub.f32 %v1171_v14, %v1177_v21 }
 0x54c   :  { %v1181_v27 = vadd.f32 1e-05, %v1179_v16 }
 0x54e   :  { %3315 = vrsqrt.f32 %v1181_v27 }
 0x558   :  { %v3316_v17 = vpop.eup %3315 }
 0x559   :  { %v1184_v18 = vrot.slane %v3316_v17, 1 }
 0x55b   :  { %v1186_v37 = vmul.f32 %v1184_v18, %v1180_v31  ;;  %v1621_v18 = vld [vmem:[%s4385_s13] sm:$0xff] }
 0x55d   :  { %v1187_v20 = vmul.f32 %v1186_v37, %v1171_v14 }
 0x55f   :  { %v1189_v41 = vrot.slane %v1187_v20, 7 }
 0x561   :  { %v1191_v22 = vsub.f32 %v1180_v31, %v1189_v41  ;;  %v1623_v41 = vld [vmem:[%s4385_s13 + $0x10] sm:$0xff] }
 0x563   :  { %v1192_v51 = vsel %vm484_vm2, %v1186_v37, %v1191_v22  ;;  %v1622_v37 = vld [vmem:[%s4385_s13 + $0x8] sm:$0xff]  ;;  %v1624_v22 = vld [vmem:[%s4385_s13 + $0x18] sm:$0xff] }
 0x564   :  { %2995 = vmatmul.mubr.msk.f32.vlgmr.msra.gmra.mrb[20].mxu0 %vm1194_vm5, %v1192_v51  ;;  %v3153_v20 = vpack.c.bf16 %v1622_v37, %v1621_v18  ;;  %v1626_v51 = vld [vmem:[%s4385_s13 + $0x28] sm:$0xff]  ;;  %v3289_v37 = vld [vmem:[%s4388_s16] sm:$0xff]  }
 0x565   :  { %2827 = vmatpush3.bf16.msra.mxu0 %v3267_v47  ;;  %v3156_v47 = vpack.c.bf16 %v1624_v22, %v1623_v41  ;;  %v3291_v41 = vld [vmem:[%s4388_s16 + $0x10] sm:$0xff]   ;;  %v3292_v22 = vld [vmem:[%s4388_s16 + $0x18] sm:$0xff]  }
 0x566   :  { %2828 = vmatprep.subr.bf16.mxu0 %v3269_v23  ;;  %v1625_v23 = vld [vmem:[%s4385_s13 + $0x20] sm:$0xff] }
 0x569   :  { %2829 = vmatpush3.bf16.msra.mxu0 %v3270_v24  ;;  %v3159_v24 = vpack.c.bf16 %v1626_v51, %v1625_v23  ;;  %v3294_v23 = vld [vmem:[%s4388_s16 + $0x28] sm:$0xff]   ;;  %v3295_v51 = vld [vmem:[%s4388_s16 + $0x30] sm:$0xff]  }
 0x56a   :  { %2830 = vmatprep.subr.bf16.mxu0 %v3272_v25  ;;  %v1627_v25 = vld [vmem:[%s4385_s13 + $0x30] sm:$0xff] }
 0x56d   :  { %2831 = vmatpush3.bf16.msra.mxu0 %v3273_v26  ;;  %v1628_v26 = vld [vmem:[%s4385_s13 + $0x38] sm:$0xff] }
 0x56e   :  { %2832 = vmatprep.subr.bf16.mxu0 %v3275_v30  ;;  %v3162_v28 = vpack.c.bf16 %v1628_v26, %v1627_v25  ;;  %v3297_v25 = vld [vmem:[%s4388_s16 + $0x40] sm:$0xff]   ;;  %v3298_v26 = vld [vmem:[%s4388_s16 + $0x48] sm:$0xff]  }
 0x571   :  { %2833 = vmatpush3.bf16.msra.mxu0 %v3276_v33 }
 0x572   :  { %2834 = vmatprep.subr.bf16.mxu0 %v3278_v35 }
 0x575   :  { %2835 = vmatpush3.bf16.msra.mxu0 %v3279_v36 }
 0x576   :  { %2836 = vmatprep.subr.bf16.mxu0 %v3281_v39 }
 0x579   :  { %2837 = vmatpush3.bf16.msra.mxu0 %v3282_v40 }
 0x57a   :  { %2838 = vmatprep.subr.bf16.mxu0 %v3284_v44 }
 0x57d   :  { %2839 = vmatpush3.bf16.msra.mxu0 %v3285_v45 }
 0x57e   :  { %2840 = vmatprep.subr.bf16.mxu0 %v3287_v46 }
 0x581   :  { %2841 = vmatpush3.bf16.msra.mxu0 %v3288_v50 }
 0x582   :  { %3152 = vmatprep.subr.bf16.mxu0 %v3352_v59 }
 0x637   :  { %v1264_v52 = vpop.f32.mrb[20].mxu0 }
 0x638   :  { %v1271_v53 = vrot.slane %v1264_v52, %v3872_v58  ;;  %v2996_v54 = vpop.f32.mrb[21].mxu0  ;;  %v1279_v56 = vrot.slane %v1264_v52, %v3874_v60 }
 0x63a   :  { %v1272_v57 = vmul.f32 %v1271_v53, %v3946_v29  ;;  %v1273_v61 = vmul.f32 %v1271_v53, %v3948_v32  ;;  %v1274_v62 = vmul.f32 %v1271_v53, %v3956_v43  ;;  %v1275_v63 = vmul.f32 %v1271_v53, %v3961_v49  ;;  %v1306_v29 = vpop.permute.xlu0 %1305 }
 0x63c   :  { %v1280_v0 = vadd.f32 %v1279_v56, %v1272_v57  ;;  %v1281_v1 = vadd.f32 %v1279_v56, %v1273_v61  ;;  %v1282_v3 = vadd.f32 %v1279_v56, %v1274_v62  ;;  %v1283_v4 = vadd.f32 %v1279_v56, %v1275_v63 }
 0x63e   :  { %v1284_v5 = vmul.f32 0.01, %v1280_v0  ;;  %v1285_v6 = vmul.f32 0.01, %v1281_v1  ;;  %v1286_v7 = vmul.f32 0.01, %v1282_v3 }
 0x63f   :  { %v1287_v8 = vmul.f32 0.01, %v1283_v4 }
 0x640   :  { %v1288_v10 = vmax.f32 %v1280_v0, %v1284_v5  ;;  %v1289_v11 = vmax.f32 %v1281_v1, %v1285_v6  ;;  %v1290_v12 = vmax.f32 %v1282_v3, %v1286_v7 }
 0x641   :  { %v1291_v9 = vmax.f32 %v1283_v4, %v1287_v8 }
 0x642   :  { %1293 = vst [vmem:[#allocation4 + $0x8] sm:$0xff] %v1288_v10  ;;  %1294 = vst [vmem:[#allocation4 + $0x10] sm:$0xff] %v1289_v11 }
 0x643   :  { %1295 = vst [vmem:[#allocation4 + $0x18] sm:$0xff] %v1290_v12  ;;  %1296 = vst [vmem:[#allocation4 + $0x20] sm:$0xff] %v1291_v9  ;;  %v1720_v9 = vld [vmem:[%s4386_s14] sm:$0xff] }
 0x649   :  { %v1316_v32 = vld [vmem:[#allocation4 + $0x8] ss:$2 sm:$0xff]  ;;  %v1320_v43 = vld [vmem:[#allocation4 + $0x9] ss:$2 sm:$0xff] }
 0x64a   :  { %v1298_v49 = vld [vmem:[#allocation4 + $0x7] ss:$2 sm:$0xff]  ;;  %v1318_v14 = vld [vmem:[#allocation4 + $0x18] ss:$2 sm:$0xff]  ;;  %v1300_v15 = vld [vmem:[#allocation4 + $0x17] ss:$2 sm:$0xff] }
 0x64b   :  { %v1322_v19 = vld [vmem:[#allocation4 + $0x19] ss:$2 sm:$0xff]  ;;  %v1313_v21 = vmul.f32 %v1306_v29, %v1298_v49  ;;  %v1324_v16 = vpack.c.bf16 %v1318_v14, %v1316_v32  ;;  %v1314_v17 = vmul.f32 %v1311_v13, %v1300_v15  ;;  %v1707_v15 = vld [vmem:[%s4387_s15] sm:$0x3] }
 0x64c   :  { %v1325_v27 = vpack.c.bf16 %v1322_v19, %v1320_v43 }
 0x64d   :  { %1550 = vmatprep.mubr.bf16.mxu0 %v1324_v16  ;;  %v1323_v31 = vpack.c.bf16 %v1314_v17, %v1313_v21 }
 0x64e   :  { %3014 = vmatmul.mubr.bf16.vlgmr.msra.gmra.mrb[16].mxu1 %v1325_v27 }
 0x64f   :  { %1551 = vmatmul.mubr.bf16.vlgmr.msra.gmra.mrb[24].mxu0 %v1323_v31  ;;  %1933 = vmatpush1.bf16.msra.mxu1 %v3289_v37 }
 0x650   :  { %3033 = vmatprep.mubr.msk.f32.mxu0 %vm3353_vm1, %v3868_v55  ;;  %3154 = vmatpush3.bf16.msra.mxu0 %v3153_v20  ;;  %v3290_v20 = vld [vmem:[%s4388_s16 + $0x8] sm:$0xff]  }
 0x651   :  { %3155 = vmatprep.subr.bf16.mxu0 %v3352_v59  ;;  %1934 = vmatprep.subr.bf16.mxu1 %v3349_v2 }
 0x653   :  { %1935 = vmatpush1.bf16.msra.mxu1 %v3290_v20 }
 0x654   :  { %3157 = vmatpush3.bf16.msra.mxu0 %v3156_v47  ;;  %1936 = vmatprep.subr.bf16.mxu1 %v3349_v2  ;;  %v3293_v47 = vld [vmem:[%s4388_s16 + $0x20] sm:$0xff]  }
 0x655   :  { %3158 = vmatprep.subr.bf16.mxu0 %v3352_v59 }
 0x657   :  { %1937 = vmatpush1.bf16.msra.mxu1 %v3291_v41 }
 0x658   :  { %3160 = vmatpush3.bf16.msra.mxu0 %v3159_v24  ;;  %1938 = vmatprep.subr.bf16.mxu1 %v3349_v2  ;;  %v3296_v24 = vld [vmem:[%s4388_s16 + $0x38] sm:$0xff]  }
 0x659   :  { %3161 = vmatprep.subr.bf16.mxu0 %v3352_v59 }
 0x65b   :  { %1939 = vmatpush1.bf16.msra.mxu1 %v3292_v22 }
 0x65c   :  { %3163 = vmatpush3.bf16.msra.mxu0 %v3162_v28  ;;  %1940 = vmatprep.subr.bf16.mxu1 %v3349_v2  ;;  %v3299_v28 = vld [vmem:[%s4388_s16 + $0x50] sm:$0xff]  }
 0x65d   :  { %3036 = vmatprep.subr.mxu0 %v3868_v55 }
 0x65f   :  { %1941 = vmatpush1.bf16.msra.mxu1 %v3293_v47 }
 0x660   :  { %1942 = vmatprep.subr.bf16.mxu1 %v3349_v2 }
 0x663   :  { %1943 = vmatpush1.bf16.msra.mxu1 %v3294_v23 }
 0x664   :  { %1944 = vmatprep.subr.bf16.mxu1 %v3349_v2 }
 0x667   :  { %1945 = vmatpush1.bf16.msra.mxu1 %v3295_v51  ;;  %v2087_v51 = vld [vmem:[%s4391_s19] sm:$0xff] }
 0x668   :  { %1946 = vmatprep.subr.bf16.mxu1 %v3349_v2 }
 0x66b   :  { %1947 = vmatpush1.bf16.msra.mxu1 %v3296_v24  ;;  %v2088_v24 = vld [vmem:[%s4391_s19 + $0x8] sm:$0xff] }
 0x66c   :  { %1948 = vmatprep.subr.bf16.mxu1 %v3349_v2 }
 0x66f   :  { %1949 = vmatpush1.bf16.msra.mxu1 %v3297_v25  ;;  %v3177_v25 = vpack.c.bf16 %v2088_v24, %v2087_v51 }
 0x670   :  { %1950 = vmatprep.subr.bf16.mxu1 %v3349_v2 }
 0x673   :  { %1951 = vmatpush1.bf16.msra.mxu1 %v3298_v26 }
 0x674   :  { %1952 = vmatprep.subr.bf16.mxu1 %v3349_v2 }
 0x677   :  { %1953 = vmatpush1.bf16.msra.mxu1 %v3299_v28 }
 0x678   :  { %1954 = vmatprep.subr.bf16.mxu1 %v3349_v2 }
 0x721   :  { %v1593_v30 = vpop.f32.mrb[16].mxu1 }
 0x722   :  { %v3015_v33 = vpop.f32.mrb[17].mxu1  ;;  %v2842_v34 = vpop.f32.mrb[24].mxu0 }
 0x723   :  { %v1596_v35 = vpop.f32.mrb[18].mxu1  ;;  %v2843_v36 = vpop.f32.mrb[25].mxu0 }
 0x724   :  { %v3016_v38 = vpop.f32.mrb[19].mxu1  ;;  %v2844_v39 = vadd.f32 %v2843_v36, %v2842_v34  ;;  %v2845_v40 = vpop.f32.mrb[26].mxu0 }
 0x725   :  { %v2846_v42 = vpop.f32.mrb[27].mxu0 }
 0x726   :  { %v4094_v44 = vadd.f32 %v2844_v39, %v1593_v30  ;;  %v2847_v45 = vadd.f32 %v2846_v42, %v2845_v40  ;;  %v3300_v39 = vld [vmem:[%s4388_s16 + $0x58] sm:$0xff]  }
 0x727   :  { %1955 = vmatpush1.bf16.msra.mxu1 %v3300_v39 }
 0x728   :  { %v1609_v46 = vmul.f32 %v4094_v44, %v4094_v44  ;;  %v4098_v48 = vadd.f32 %v2847_v45, %v1596_v35  ;;  %v1600_v50 = vsel %vm107_vm0, %v4094_v44, 0.0  ;;  %3179 = vmatprep.subr.bf16.mxu1 %v3352_v59 }
 0x72a   :  { %v1601_v52 = vsel %vm107_vm0, %v4098_v48, 0.0  ;;  %v1610_v53 = vmul.f32 %v4098_v48, %v4098_v48  ;;  %v1611_v56 = vsel %vm107_vm0, %v1609_v46, 0.0 }
 0x72b   :  { %v1602_v54 = vadd.f32 %v1601_v52, %v1600_v50 }
 0x72c   :  { %v1612_v57 = vsel %vm107_vm0, %v1610_v53, 0.0 }
 0x72d   :  { %v1603_v61 = vrot.slane %v1602_v54, 4  ;;  %v1613_v62 = vadd.f32 %v1612_v57, %v1611_v56  ;;  %v1819_v56 = vpop.permute.xlu0 %1818 }
 0x72f   :  { %v1604_v63 = vadd.f32 %v1603_v61, %v1602_v54  ;;  %v1614_v0 = vrot.slane %v1613_v62, 4 }
 0x731   :  { %v1605_v1 = vrot.slane %v1604_v63, 2  ;;  %v1615_v3 = vadd.f32 %v1614_v0, %v1613_v62  ;;  %v1988_v0 = vld [vmem:[%s4390_s18] sm:$0xff] }
 0x733   :  { %v1606_v4 = vadd.f32 %v1605_v1, %v1604_v63  ;;  %v1616_v5 = vrot.slane %v1615_v3, 2  ;;  %v1989_v1 = vld [vmem:[%s4390_s18 + $0x8] sm:$0xff] }
 0x735   :  { %v1607_v6 = vrot.slane %v1606_v4, 1  ;;  %v1617_v7 = vadd.f32 %v1616_v5, %v1615_v3  ;;  %v3165_v3 = vpack.c.bf16 %v1989_v1, %v1988_v0  ;;  %v1991_v5 = vld [vmem:[%s4390_s18 + $0x18] sm:$0xff] }
 0x737   :  { %v1618_v8 = vrot.slane %v1617_v7, 1  ;;  %v1608_v10 = vadd.f32 %v1607_v6, %v1606_v4  ;;  %v1990_v4 = vld [vmem:[%s4390_s18 + $0x10] sm:$0xff] }
 0x738   :  { %v3168_v6 = vpack.c.bf16 %v1991_v5, %v1990_v4 }
 0x739   :  { %v1619_v11 = vadd.f32 %v1618_v8, %v1617_v7  ;;  %v1992_v7 = vld [vmem:[%s4390_s18 + $0x20] sm:$0xff]  ;;  %v1993_v8 = vld [vmem:[%s4390_s18 + $0x28] sm:$0xff] }
 0x73b   :  { %v1620_v12 = vsel %vm484_vm2, %v1608_v10, %v1619_v11  ;;  %v3171_v10 = vpack.c.bf16 %v1993_v8, %v1992_v7  ;;  %v1994_v11 = vld [vmem:[%s4390_s18 + $0x30] sm:$0xff]  ;;  %v3312_v7 = vld [vmem:[%s4393_s21 + $0x58] sm:$0xff]  }
 0x73c   :  { %3034 = vmatmul.mubr.msk.f32.vlgmr.msra.gmra.mrb[22].mxu0 %vm107_vm0, %v1620_v12  ;;  %v1995_v12 = vld [vmem:[%s4390_s18 + $0x38] sm:$0xff] }
 0x73d   :  { %3038 = vmatprep.mubr.msk.f32.mxu0 %vm3353_vm1, %v3868_v55  ;;  %3037 = vmatpush3.msra.mxu0 %v1720_v9  ;;  %v3174_v9 = vpack.c.bf16 %v1995_v12, %v1994_v11 }
 0x73e   :  { %3164 = vmatprep.subr.bf16.mxu0 %v3352_v59 }
 0x80f   :  { %v1698_v29 = vpop.f32.mrb[22].mxu0 }
 0x810   :  { %v1702_v32 = vmul.f32 %v1698_v29, %v1698_v29  ;;  %v3035_v43 = vpop.f32.mrb[23].mxu0 }
 0x812   :  { %v1704_v49 = vrot.slane %v1702_v32, 7 }
 0x814   :  { %v1706_v13 = vsub.f32 %v1698_v29, %v1704_v49 }
 0x816   :  { %v1708_v14 = vadd.f32 1e-05, %v1706_v13 }
 0x818   :  { %3317 = vrsqrt.f32 %v1708_v14 }
 0x822   :  { %v3318_v19 = vpop.eup %3317 }
 0x823   :  { %v1711_v21 = vrot.slane %v3318_v19, 1 }
 0x825   :  { %v1713_v16 = vmul.f32 %v1711_v21, %v1707_v15 }
 0x827   :  { %v1714_v27 = vmul.f32 %v1713_v16, %v1698_v29 }
 0x829   :  { %v1716_v17 = vrot.slane %v1714_v27, 7 }
 0x82b   :  { %v1718_v31 = vsub.f32 %v1707_v15, %v1716_v17 }
 0x82d   :  { %v1719_v18 = vsel %vm484_vm2, %v1713_v16, %v1718_v31 }
 0x82e   :  { %3039 = vmatmul.mubr.msk.f32.vlgmr.msra.gmra.mrb[28].mxu0 %vm1194_vm5, %v1719_v18 }
 0x82f   :  { %3057 = vmatprep.mubr.msk.f32.mxu0 %vm3353_vm1, %v3868_v55  ;;  %3166 = vmatpush3.bf16.msra.mxu0 %v3165_v3 }
 0x830   :  { %3167 = vmatprep.subr.bf16.mxu0 %v3352_v59 }
 0x833   :  { %3169 = vmatpush3.bf16.msra.mxu0 %v3168_v6 }
 0x834   :  { %3170 = vmatprep.subr.bf16.mxu0 %v3352_v59 }
 0x837   :  { %3172 = vmatpush3.bf16.msra.mxu0 %v3171_v10 }
 0x838   :  { %3173 = vmatprep.subr.bf16.mxu0 %v3352_v59 }
 0x83b   :  { %3175 = vmatpush3.bf16.msra.mxu0 %v3174_v9 }
 0x83c   :  { %3176 = vmatprep.subr.bf16.mxu0 %v3352_v59 }
 0x901   :  { %v1790_v30 = vpop.f32.mrb[28].mxu0 }
 0x902   :  { %v1797_v33 = vrot.slane %v1790_v30, %v3872_v58  ;;  %v3040_v34 = vpop.f32.mrb[29].mxu0  ;;  %v1803_v38 = vrot.slane %v1790_v30, %v3874_v60 }
 0x904   :  { %v1798_v35 = vmul.f32 %v1797_v33, %v4094_v44  ;;  %v1799_v36 = vmul.f32 %v1797_v33, %v4098_v48 }
 0x906   :  { %v1804_v40 = vadd.f32 %v1803_v38, %v1798_v35  ;;  %v1805_v42 = vadd.f32 %v1803_v38, %v1799_v36  ;;  %v2074_v36 = vld [vmem:[%s4392_s20] sm:$0x3] }
 0x908   :  { %v1806_v45 = vmul.f32 0.01, %v1804_v40  ;;  %v1807_v46 = vmul.f32 0.01, %v1805_v42 }
 0x90a   :  { %v1808_v50 = vmax.f32 %v1804_v40, %v1806_v45  ;;  %v1809_v52 = vmax.f32 %v1805_v42, %v1807_v46 }
 0x90c   :  { %1811 = vst.msk [vmem:[#allocation5 + $0x8] sm:$0xff] %vm107_vm0, %v1808_v50  ;;  %1812 = vst.msk [vmem:[#allocation5 + $0x10] sm:$0xff] %vm107_vm0, %v1809_v52  ;;  %v3301_v50 = vld [vmem:[%s4393_s21] sm:$0xff]   ;;  %v3302_v52 = vld [vmem:[%s4393_s21 + $0x8] sm:$0xff]  }
 0x913   :  { %v1823_v44 = vld [vmem:[#allocation5 + $0x8] ss:$2 sm:$0xff]  ;;  %v1825_v48 = vld [vmem:[#allocation5 + $0x9] ss:$2 sm:$0xff] }
 0x914   :  { %1827 = vrot.lane.b32.xlu1 %v1823_v44, %s3351_s0  ;;  %v1832_v53 = vpack.c.bf16 %v1825_v48, %v1825_v48  ;;  %v1814_v54 = vld [vmem:[#allocation5 + $0x7] ss:$2 sm:$0xff]  ;;  %v3303_v44 = vld [vmem:[%s4393_s21 + $0x10] sm:$0xff]  }
 0x915   :  { %v1821_v57 = vmul.f32 %v1819_v56, %v1814_v54  ;;  %v3304_v48 = vld [vmem:[%s4393_s21 + $0x18] sm:$0xff]   ;;  %v3306_v54 = vld [vmem:[%s4393_s21 + $0x28] sm:$0xff]   ;;  %v3307_v56 = vld [vmem:[%s4393_s21 + $0x30] sm:$0xff]  }
 0x916   :  { %2730 = vmatprep.mubr.msk.bf16.mxu1 %vm107_vm0, %v1832_v53  ;;  %v3305_v53 = vld [vmem:[%s4393_s21 + $0x20] sm:$0xff]  }
 0x986   :  { %v1828_v61 = vpop.permute.xlu1 %1827 }
 0x987   :  { %v1830_v62 = vsel %vm107_vm0, %v1821_v57, %v1828_v61  ;;  %v3308_v57 = vld [vmem:[%s4393_s21 + $0x38] sm:$0xff]   ;;  %v3309_v61 = vld [vmem:[%s4393_s21 + $0x40] sm:$0xff]  }
 0x988   :  { %v1831_v63 = vpack.c.bf16 %v1830_v62, %v1830_v62  ;;  %v3310_v62 = vld [vmem:[%s4393_s21 + $0x48] sm:$0xff]  }
 0x98a   :  { %1965 = vmatmul.mubr.bf16.vlgmr.msra.gmra.mrb[20].mxu1 %v1831_v63  ;;  %v3311_v63 = vld [vmem:[%s4393_s21 + $0x50] sm:$0xff]  }
 0x98b   :  { %3075 = vmatprep.mubr.msk.f32.mxu1 %vm3353_vm1, %v3868_v55 }
 0xa5d   :  { %v4210_v29 = vpop.f32.mrb[20].mxu1 }
 0xa5e   :  { %v1972_v32 = vsel %vm107_vm0, %v4210_v29, 0.0  ;;  %v1979_v43 = vmul.f32 %v4210_v29, %v4210_v29  ;;  %v1968_v49 = vpop.f32.mrb[21].mxu1 }
 0xa5f   :  { %v1973_v13 = vrot.slane %v1972_v32, 4  ;;  %v1969_v14 = vpop.f32.mrb[22].mxu1 }
 0xa60   :  { %v1980_v19 = vsel %vm107_vm0, %v1979_v43, 0.0  ;;  %v1970_v15 = vpop.f32.mrb[23].mxu1  ;;  %v2353_v14 = vld [vmem:[%s4395_s23] sm:$0xff] }
 0xa61   :  { %v1974_v21 = vadd.f32 %v1973_v13, %v1972_v32  ;;  %v1981_v16 = vrot.slane %v1980_v19, 4 }
 0xa63   :  { %v1975_v27 = vrot.slane %v1974_v21, 2  ;;  %v1982_v17 = vadd.f32 %v1981_v16, %v1980_v19  ;;  %v2354_v19 = vld [vmem:[%s4395_s23 + $0x8] sm:$0xff]  ;;  %v2356_v16 = vld [vmem:[%s4395_s23 + $0x18] sm:$0xff] }
 0xa64   :  { %v3180_v15 = vpack.c.bf16 %v2354_v19, %v2353_v14 }
 0xa65   :  { %v1976_v31 = vadd.f32 %v1975_v27, %v1974_v21  ;;  %v1983_v18 = vrot.slane %v1982_v17, 2  ;;  %v2355_v21 = vld [vmem:[%s4395_s23 + $0x10] sm:$0xff] }
 0xa66   :  { %3181 = vmatpush3.bf16.msra.mxu1 %v3180_v15  ;;  %v3183_v27 = vpack.c.bf16 %v2356_v16, %v2355_v21 }
 0xa67   :  { %v1977_v37 = vrot.slane %v1976_v31, 1  ;;  %v1984_v20 = vadd.f32 %v1983_v18, %v1982_v17  ;;  %3182 = vmatprep.subr.bf16.mxu1 %v3352_v59 }
 0xa69   :  { %v1985_v41 = vrot.slane %v1984_v20, 1  ;;  %v1978_v22 = vadd.f32 %v1977_v37, %v1976_v31 }
 0xa6a   :  { %3184 = vmatpush3.bf16.msra.mxu1 %v3183_v27 }
 0xa6b   :  { %v1986_v47 = vadd.f32 %v1985_v41, %v1984_v20  ;;  %3185 = vmatprep.subr.bf16.mxu1 %v3352_v59 }
 0xa6d   :  { %v1987_v23 = vsel %vm484_vm2, %v1978_v22, %v1986_v47 }
 0xa6e   :  { %3058 = vmatmul.mubr.msk.f32.vlgmr.msra.gmra.mrb[30].mxu0 %vm107_vm0, %v1987_v23 }
 0xa6f   :  { %3064 = vmatprep.mubr.msk.f32.mxu0 %vm3353_vm1, %v3868_v55  ;;  %3178 = vmatpush3.bf16.msra.mxu0 %v3177_v25 }
 0xa70   :  { %2296 = vmatprep.subr.bf16.mxu0 %v3349_v2 }
 0xb41   :  { %v2065_v26 = vpop.f32.mrb[30].mxu0 }
 0xb42   :  { %v2069_v28 = vmul.f32 %v2065_v26, %v2065_v26  ;;  %v3059_v30 = vpop.f32.mrb[31].mxu0 }
 0xb44   :  { %v2071_v33 = vrot.slane %v2069_v28, 7 }
 0xb46   :  { %v2073_v34 = vsub.f32 %v2065_v26, %v2071_v33 }
 0xb48   :  { %v2075_v35 = vadd.f32 1e-05, %v2073_v34 }
 0xb4a   :  { %3319 = vrsqrt.f32 %v2075_v35 }
 0xb54   :  { %v3320_v55 = vpop.eup %3319 }
 0xb55   :  { %v2078_v38 = vrot.slane %v3320_v55, 1 }
 0xb57   :  { %v2080_v39 = vmul.f32 %v2078_v38, %v2074_v36  ;;  %v3324_v38 = vld [vmem:[#allocation3] sm:$0xff] }
 0xb59   :  { %v2081_v40 = vmul.f32 %v2080_v39, %v2065_v26 }
 0xb5b   :  { %v2083_v42 = vrot.slane %v2081_v40, 7  ;;  %v2450_v40 = vld [vmem:[%s4396_s24 + $0x8] sm:$0xff] }
 0xb5d   :  { %v2085_v45 = vsub.f32 %v2074_v36, %v2083_v42 }
 0xb5f   :  { %v2086_v46 = vsel %vm484_vm2, %v2080_v39, %v2085_v45  ;;  %v2449_v39 = vld [vmem:[%s4396_s24] sm:$0xff] }
 0xb60   :  { %3065 = vmatmul.mubr.msk.f32.vlgmr.msra.gmra.mrb[32].mxu0 %vm2089_vm6, %v2086_v46  ;;  %v3186_v42 = vpack.c.bf16 %v2450_v40, %v2449_v39 }
 0xb61   :  { %2297 = vmatpush1.bf16.msra.mxu0 %v3301_v50 }
 0xb62   :  { %2298 = vmatprep.subr.bf16.mxu0 %v3349_v2 }
 0xb65   :  { %2299 = vmatpush1.bf16.msra.mxu0 %v3302_v52 }
 0xb66   :  { %2300 = vmatprep.subr.bf16.mxu0 %v3349_v2 }
 0xb69   :  { %2301 = vmatpush1.bf16.msra.mxu0 %v3303_v44 }
 0xb6a   :  { %2302 = vmatprep.subr.bf16.mxu0 %v3349_v2 }
 0xb6d   :  { %2303 = vmatpush1.bf16.msra.mxu0 %v3304_v48 }
 0xb6e   :  { %2304 = vmatprep.subr.bf16.mxu0 %v3349_v2 }
 0xb71   :  { %2305 = vmatpush1.bf16.msra.mxu0 %v3305_v53 }
 0xb72   :  { %2306 = vmatprep.subr.bf16.mxu0 %v3349_v2 }
 0xb75   :  { %2307 = vmatpush1.bf16.msra.mxu0 %v3306_v54  ;;  %v2436_v54 = vld [vmem:[%s4397_s25] sm:$0x3] }
 0xb76   :  { %2308 = vmatprep.subr.bf16.mxu0 %v3349_v2 }
 0xb79   :  { %2309 = vmatpush1.bf16.msra.mxu0 %v3307_v56 }
 0xb7a   :  { %2310 = vmatprep.subr.bf16.mxu0 %v3349_v2 }
 0xb7d   :  { %2311 = vmatpush1.bf16.msra.mxu0 %v3308_v57 }
 0xb7e   :  { %2312 = vmatprep.subr.bf16.mxu0 %v3349_v2 }
 0xb81   :  { %2313 = vmatpush1.bf16.msra.mxu0 %v3309_v61 }
 0xb82   :  { %2314 = vmatprep.subr.bf16.mxu0 %v3349_v2 }
 0xb85   :  { %2315 = vmatpush1.bf16.msra.mxu0 %v3310_v62 }
 0xb86   :  { %2316 = vmatprep.subr.bf16.mxu0 %v3349_v2 }
 0xb89   :  { %2317 = vmatpush1.bf16.msra.mxu0 %v3311_v63 }
 0xb8a   :  { %2318 = vmatprep.subr.bf16.mxu0 %v3349_v2 }
 0xb8d   :  { %2319 = vmatpush1.bf16.msra.mxu0 %v3312_v7 }
 0xc33   :  { %v2159_v0 = vpop.f32.mrb[32].mxu0 }
 0xc34   :  { %v2166_v1 = vrot.slane %v2159_v0, %v3872_v58  ;;  %v3066_v3 = vpop.f32.mrb[33].mxu0  ;;  %v2171_v5 = vrot.slane %v2159_v0, %v3874_v60 }
 0xc35   :  { %v2546_v3 = vld [vmem:[%s4398_s26 + $0x8] sm:$0xff] }
 0xc36   :  { %v2167_v4 = vmul.f32 %v2166_v1, %v4210_v29  ;;  %v2183_v29 = vpop.permute.xlu0 %2182  ;;  %v2545_v1 = vld [vmem:[%s4398_s26] sm:$0xff] }
 0xc38   :  { %v2172_v6 = vadd.f32 %v2171_v5, %v2167_v4  ;;  %v2547_v4 = vld [vmem:[%s4398_s26 + $0x10] sm:$0xff]  ;;  %v3189_v5 = vpack.c.bf16 %v2546_v3, %v2545_v1 }
 0xc3a   :  { %v2173_v8 = vmul.f32 0.01, %v2172_v6 }
 0xc3c   :  { %v2174_v10 = vmax.f32 %v2172_v6, %v2173_v8  ;;  %v2548_v6 = vld [vmem:[%s4398_s26 + $0x18] sm:$0xff]  ;;  %v2549_v8 = vld [vmem:[%s4398_s26 + $0x20] sm:$0xff] }
 0xc3d   :  { %v3192_v7 = vpack.c.bf16 %v2548_v6, %v2547_v4 }
 0xc3e   :  { %2176 = vst.msk [vmem:[#allocation6 + $0x8] sm:$0xff] %vm107_vm0, %v2174_v10  ;;  %v2550_v10 = vld [vmem:[%s4398_s26 + $0x28] sm:$0xff] }
 0xc45   :  { %v2187_v11 = vld [vmem:[#allocation6 + $0x8] ss:$2 sm:$0xf]  ;;  %v2189_v2 = vld [vmem:[#allocation6 + $0x9] ss:$2 sm:$0xf] }
 0xc46   :  { %2191 = vrot.lane.b32.xlu1 %v2187_v11, %s3351_s0  ;;  %v2196_v12 = vpack.c.bf16 %v2189_v2, %v2189_v2  ;;  %v2178_v9 = vld [vmem:[#allocation6 + $0x7] ss:$2 sm:$0xf]  ;;  %v3195_v11 = vpack.c.bf16 %v2550_v10, %v2549_v8  ;;  %s3355_s0 = smov [#allocation8]  }
 0xc47   :  { %v2185_v32 = vmul.f32 %v2183_v29, %v2178_v9  ;;  %v2551_v2 = vld [vmem:[%s4398_s26 + $0x30] sm:$0xff]  ;;  %s2641_s20 = sshll.u32 %s3355_s0, 4  ;;  %s2642_s20 = int_to_ptr.vmem [resolvable:$true] %s2641_s20 }
 0xc48   :  { %2745 = vmatprep.mubr.msk.bf16.mxu0 %vm107_vm0, %v2196_v12  ;;  %v2552_v12 = vld [vmem:[%s4398_s26 + $0x38] sm:$0xff]  ;;  %s3354_s26 = smov 32   ;;  %s3325_s1 = scalar_lea.vmem %s2642_s20, 32 }
 0xc49   :  { %v3198_v9 = vpack.c.bf16 %v2552_v12, %v2551_v2  ;;  %p3326_p0 = scmp.ne.s32.totalorder %s2642_s20, %s3325_s1  ;;  %p3330_p1 = scmp.lt.s32.totalorder %s2642_s20, %s2642_s20 }
 0xc4a   :  { %p3331_p2 = scmp.lt.s32.totalorder %s3325_s1, %s3325_s1 }
 0xc4c   :  { %p3332_p3 = por %p3331_p2, %p3330_p1 }
 0xc4e   :  { %p3333_p4 = pnand %p3332_p3, %p3326_p0 }
 0xcb8   :  { %v2192_v43 = vpop.permute.xlu1 %2191 }
 0xcb9   :  { %v2194_v49 = vsel %vm107_vm0, %v2185_v32, %v2192_v43 }
 0xcba   :  { %v2195_v13 = vpack.c.bf16 %v2194_v49, %v2194_v49 }
 0xcbc   :  { %2329 = vmatmul.mubr.bf16.vlgmr.msra.gmra.mrb[36].mxu0 %v2195_v13 }
 0xd8f   :  { %v4301_v17 = vpop.f32.mrb[36].mxu0 }
 0xd90   :  { %v2337_v31 = vsel %vm2336_vm7, %v4301_v17, 0.0  ;;  %v2344_v18 = vmul.f32 %v4301_v17, %v4301_v17  ;;  %v2332_v37 = vpop.f32.mrb[37].mxu0 }
 0xd91   :  { %v2338_v20 = vrot.slane %v2337_v31, 4  ;;  %v2333_v41 = vpop.f32.mrb[38].mxu0 }
 0xd92   :  { %v2345_v22 = vsel %vm2336_vm7, %v2344_v18, 0.0  ;;  %v2334_v47 = vpop.f32.mrb[39].mxu0 }
 0xd93   :  { %v2339_v23 = vadd.f32 %v2338_v20, %v2337_v31  ;;  %v2346_v51 = vrot.slane %v2345_v22, 4 }
 0xd95   :  { %v2340_v24 = vrot.slane %v2339_v23, 2  ;;  %v2347_v25 = vadd.f32 %v2346_v51, %v2345_v22 }
 0xd97   :  { %v2341_v26 = vadd.f32 %v2340_v24, %v2339_v23  ;;  %v2348_v28 = vrot.slane %v2347_v25, 2 }
 0xd99   :  { %v2342_v30 = vrot.slane %v2341_v26, 1  ;;  %v2349_v33 = vadd.f32 %v2348_v28, %v2347_v25 }
 0xd9b   :  { %v2350_v34 = vrot.slane %v2349_v33, 1  ;;  %v2343_v35 = vadd.f32 %v2342_v30, %v2341_v26 }
 0xd9d   :  { %v2351_v55 = vadd.f32 %v2350_v34, %v2349_v33 }
 0xd9f   :  { %v2352_v36 = vsel %vm484_vm2, %v2343_v35, %v2351_v55 }
 0xda0   :  { %3076 = vmatmul.mubr.msk.f32.vlgmr.msra.gmra.mrb[14].mxu1 %vm2357_vm8, %v2352_v36 }
 0xda1   :  { %3082 = vmatprep.mubr.msk.f32.mxu1 %vm3353_vm1, %v3324_v38  ;;  %3187 = vmatpush3.bf16.msra.mxu1 %v3186_v42 }
 0xda2   :  { %3188 = vmatprep.subr.bf16.mxu1 %v3352_v59 }
 0xe73   :  { %v2427_v45 = vpop.f32.mrb[14].mxu1 }
 0xe74   :  { %v2431_v46 = vmul.f32 %v2427_v45, %v2427_v45  ;;  %v3077_v50 = vpop.f32.mrb[15].mxu1 }
 0xe76   :  { %v2433_v52 = vrot.slane %v2431_v46, 7 }
 0xe78   :  { %v2435_v44 = vsub.f32 %v2427_v45, %v2433_v52 }
 0xe7a   :  { %v2437_v48 = vadd.f32 1e-05, %v2435_v44 }
 0xe7c   :  { %3321 = vrsqrt.f32 %v2437_v48 }
 0xe86   :  { %v3322_v53 = vpop.eup %3321 }
 0xe87   :  { %v2440_v56 = vrot.slane %v3322_v53, 1 }
 0xe89   :  { %v2442_v57 = vmul.f32 %v2440_v56, %v2436_v54 }
 0xe8b   :  { %v2443_v61 = vmul.f32 %v2442_v57, %v2427_v45 }
 0xe8d   :  { %v2445_v62 = vrot.slane %v2443_v61, 7 }
 0xe8f   :  { %v2447_v63 = vsub.f32 %v2436_v54, %v2445_v62 }
 0xe91   :  { %v2448_v0 = vsel %vm484_vm2, %v2442_v57, %v2447_v63 }
 0xe92   :  { %3083 = vmatmul.mubr.msk.f32.vlgmr.msra.gmra.mrb[24].mxu1 %vm2089_vm6, %v2448_v0 }
 0xe93   :  { %3101 = vmatprep.mubr.msk.f32.mxu1 %vm3353_vm1, %v3324_v38  ;;  %3190 = vmatpush3.bf16.msra.mxu1 %v3189_v5 }
 0xe94   :  { %3191 = vmatprep.subr.bf16.mxu1 %v3352_v59 }
 0xe97   :  { %3193 = vmatpush3.bf16.msra.mxu1 %v3192_v7 }
 0xe98   :  { %3194 = vmatprep.subr.bf16.mxu1 %v3352_v59 }
 0xe9b   :  { %3196 = vmatpush3.bf16.msra.mxu1 %v3195_v11 }
 0xe9c   :  { %3197 = vmatprep.subr.bf16.mxu1 %v3352_v59 }
 0xe9f   :  { %3199 = vmatpush3.bf16.msra.mxu1 %v3198_v9 }
 0xf65   :  { %v2520_v29 = vpop.f32.mrb[24].mxu1 }
 0xf66   :  { %v2527_v32 = vrot.slane %v2520_v29, %v3872_v58  ;;  %v3084_v43 = vpop.f32.mrb[25].mxu1  ;;  %v2532_v13 = vrot.slane %v2520_v29, %v3874_v60  ;;  %v2748_v58 = vld [vmem:[%s4399_s27] ss:$0 sm:$0xff] }
 0xf68   :  { %v2528_v49 = vmul.f32 %v2527_v32, %v4301_v17 }
 0xf6a   :  { %v2533_v14 = vadd.f32 %v2532_v13, %v2528_v49 }
 0xf6c   :  { %v2534_v19 = vmul.f32 0.01, %v2533_v14 }
 0xf6e   :  { %v2535_v15 = vmax.f32 %v2533_v14, %v2534_v19 }
 0xf70   :  { %2536 = vst.msk [vmem:[#allocation7] sm:$0xf] %vm2336_vm7, %v2535_v15 }
 0xf77   :  { %v2539_v21 = vld [vmem:[#allocation7 + $0x1] ss:$2 sm:$0x3]  ;;  %v2537_v27 = vld [vmem:[#allocation7] ss:$2 sm:$0x3] }
 0xf78   :  { %2541 = vrot.lane.b32.xlu0 %v2539_v21, %s3354_s26 }
 0xfea   :  { %v2542_v16 = vpop.permute.xlu0 %2541 }
 0xfeb   :  { %v2544_v59 = vsel %vm2357_vm8, %v2537_v27, %v2542_v16 }
 0xfec   :  { %3102 = vmatmul.mubr.msk.f32.vlgmr.msra.gmra.mrb[26].mxu1 %vm107_vm0, %v2544_v59 }
0x10bf   :  { %v2629_v60 = vpop.f32.mrb[26].mxu1 }
0x10c0   :  { %v2630_v17 = vadd.f32 %v2748_v58, %v2629_v60  ;;  %v3103_v31 = vpop.f32.mrb[27].mxu1 }
0x10c2   :  { %2634 = vst.msk [vmem:[#allocation8] sm:$0x3] %vm2633_vm9, %v2630_v17 }
0x10c3   :  { %3336 = shalt.err (!%p3333_p4)
}
0x10c4   :  { %s3337_s11 = scalar_lea.hbm %s4400_s28, 32 }
0x10c5   :  { %p3338_p5 = scmp.ne.s32.totalorder %s4400_s28, %s3337_s11  ;;  %p3341_p6 = scmp.lt.u32.totalorder %s3337_s11, %s4400_s28 }
0x10c7   :  { %p3343_p7 = pnand %p3341_p6, %p3338_p5 }
0x10c9   :  { %3346 = shalt.err (!%p3343_p7)
}
0x10ca   :  { %2644 = dma.vmem_to_hbm [thread:$0]  %s2642_s20, 32, %s4400_s28, [#allocation9]  }
0x10cb   :  { %3347 = dma.done.wait [#allocation9], 32  }
0x10cc   :  { %3348 = vsyncadd [#allocation9], 4294967264 }
0x10cd   :  { %2648 = vsyncpa [#allocation9], 1 }

</bundles_post_ra>
